<compile_context>
chip_gen: v5e
topology: v5e:2x2
jax: 0.10.0
libtpu: 0.0.40
codegen_flags: <defaults>
</compile_context>

<pallas_src>
import functools

import jax
import jax.numpy as jnp
from jax.experimental import pallas as pl
from jax.experimental.pallas import tpu as pltpu


LANE = 128  # lane-dense padding width for the final channel dimension


# ---------------------------------------------------------------------------
# Kernels
# ---------------------------------------------------------------------------
def conv_stack_kernel(x_ref, w1_ref, b1_ref, w2_ref, b2_ref, w3_ref, b3_ref,
                      h_ref):
    """Pointwise (kernel_size=1) conv stack: 3 x (linear + ReLU)."""
    x = x_ref[...]
    h = jnp.dot(x, w1_ref[...], preferred_element_type=jnp.float32) + b1_ref[...]
    h = jnp.maximum(h, 0.0).astype(jnp.bfloat16)
    h = jnp.dot(h, w2_ref[...], preferred_element_type=jnp.float32) + b2_ref[...]
    h = jnp.maximum(h, 0.0).astype(jnp.bfloat16)
    h = jnp.dot(h, w3_ref[...], preferred_element_type=jnp.float32) + b3_ref[...]
    h_ref[...] = jnp.maximum(h, 0.0).astype(h_ref.dtype)


def gcn_hidden_kernel(adj_ref, hin_ref, w_ref, b_ref, out_ref, acc_ref, *,
                      tile_k):
    """Hidden GCN layer, aggregate-then-project: relu((A @ h) @ W + b).

    hin_ref is the FULL (n_pad, width) array, VMEM-resident; the adjacency is
    streamed as (TM, TK) tiles and the matching h rows are sliced in-kernel.
    """
    k = pl.program_id(1)

    @pl.when(k == 0)
    def _():
        acc_ref[...] = jnp.zeros_like(acc_ref)

    start = pl.multiple_of(k * tile_k, tile_k)
    hk = hin_ref[pl.ds(start, tile_k), :]
    acc_ref[...] += jnp.dot(adj_ref[...], hk,
                            preferred_element_type=jnp.float32)

    @pl.when(k == pl.num_programs(1) - 1)
    def _():
        agg = acc_ref[...].astype(jnp.bfloat16)
        g = jnp.dot(agg, w_ref[...], preferred_element_type=jnp.float32)
        g = g + b_ref[...]
        out_ref[...] = jnp.maximum(g, 0.0).astype(out_ref.dtype)


def gcn_hidden_proj_kernel(adj_ref, hin_ref, w_ref, b_ref, wnext_ref,
                           p_ref, acc_ref, *, tile_k):
    """gcn2 fused with gcn3's (lane-padded) projection:
         g2 = relu((A @ g1) @ W2 + b2);   p = g2 @ W3_pad
       (p is aggregated by the final kernel, keeping the N^2 matmul narrow).
    """
    k = pl.program_id(1)

    @pl.when(k == 0)
    def _():
        acc_ref[...] = jnp.zeros_like(acc_ref)

    start = pl.multiple_of(k * tile_k, tile_k)
    hk = hin_ref[pl.ds(start, tile_k), :]
    acc_ref[...] += jnp.dot(adj_ref[...], hk,
                            preferred_element_type=jnp.float32)

    @pl.when(k == pl.num_programs(1) - 1)
    def _():
        agg = acc_ref[...].astype(jnp.bfloat16)
        g = jnp.dot(agg, w_ref[...], preferred_element_type=jnp.float32)
        g = jnp.maximum(g + b_ref[...], 0.0).astype(jnp.bfloat16)
        p = jnp.dot(g, wnext_ref[...], preferred_element_type=jnp.float32)
        p_ref[...] = p.astype(p_ref.dtype)


def gcn_final_softmax_kernel(adj_ref, p_ref, b_ref, out_ref, *, tile_k):
    """gcn3 aggregation (accumulated directly in out_ref) + bias + softmax.

    out_ref is f32, lane-dense (TM, 128) and resident across the K axis, so it
    doubles as the accumulator. Padded bias lanes are -1e30 -> exp() == 0.
    """
    k = pl.program_id(1)

    @pl.when(k == 0)
    def _():
        out_ref[...] = jnp.zeros_like(out_ref)

    start = pl.multiple_of(k * tile_k, tile_k)
    pk = p_ref[pl.ds(start, tile_k), :]
    out_ref[...] += jnp.dot(adj_ref[...], pk,
                            preferred_element_type=jnp.float32)

    @pl.when(k == pl.num_programs(1) - 1)
    def _():
        logits = out_ref[...] + b_ref[...]
        m = jnp.max(logits, axis=-1, keepdims=True)
        e = jnp.exp(logits - m)
        denom = jnp.sum(e, axis=-1, keepdims=True)
        out_ref[...] = e * pl.reciprocal(denom, approx=True)


# ---------------------------------------------------------------------------
# Host-side glue
# ---------------------------------------------------------------------------
def _round_up(x, m):
    return ((x + m - 1) // m) * m


def _pick_tile(n):
    # Sized for DMA efficiency / VMEM (NOT the MXU edge); keep >= 2 row tiles
    # whenever possible so the "parallel" row axis shards across v7x's 2 TCs.
    for t in (512, 256, 128):
        if n >= 2 * t:
            return t
    return 128


def build_normalized_adj(edge_index, num_nodes):
    """Dense A_hat = D^-1/2 (A + I) D^-1/2 (torch_geometric GCNConv norm)."""
    src = edge_index[0]
    dst = edge_index[1]
    adj = jnp.zeros((num_nodes, num_nodes), jnp.float32)
    # messages flow src -> dst; duplicate edges accumulate (matches PyG).
    adj = adj.at[dst, src].add(1.0)
    adj = adj + jnp.eye(num_nodes, dtype=jnp.float32)
    deg = jnp.sum(adj, axis=1)
    dinv = jax.lax.rsqrt(jnp.maximum(deg, 1e-12))
    return adj * dinv[:, None] * dinv[None, :]


def make_params(key, input_dim, output_dim):
    """Deterministic synthetic parameters (shapes follow part_seg2.__init__)."""
    dims = [(input_dim, 32), (32, 64), (64, 128),        # cnn1..3 (1x1 convs)
            (128, 256), (256, 512), (512, output_dim)]   # gcn1..3
    params = []
    for fin, fout in dims:
        kw, kb, key = jax.random.split(key, 3)
        w = jax.random.normal(kw, (fin, fout), jnp.float32) * 0.1
        b = jax.random.normal(kb, (1, fout), jnp.float32) * 0.01
        params.append((w, b))
    return params


def part_seg2_forward(x, edge_index, params, *, tile=None):
    n = x.shape[0]
    (w1, b1), (w2, b2), (w3, b3), (wg1, bg1), (wg2, bg2), (wg3, bg3) = params
    input_dim = w1.shape[0]
    output_dim = wg3.shape[1]
    c1, c2, c3, d1, d2 = 32, 64, 128, 256, 512
    assert output_dim <= LANE

    tile = _pick_tile(n) if tile is None else tile
    n_pad = _round_up(n, tile)
    gr = n_pad // tile   # row tiles (parallel)
    gk = n_pad // tile   # reduction tiles over adjacency columns (arbitrary)

    # Normalized adjacency, zero-padded (padded rows/cols contribute nothing).
    adj = build_normalized_adj(edge_index, n)
    if n_pad != n:
        adj = jnp.pad(adj, ((0, n_pad - n), (0, n_pad - n)))
        x = jnp.pad(x, ((0, n_pad - n), (0, 0)))
    adj = adj.astype(jnp.bfloat16)
    x = x.astype(jnp.bfloat16)           # bf16 on host: halves the x DMA

    # bf16 weights (halves weight DMA, feeds MXU in bf16); biases stay f32.
    w1b, w2b, w3b = (w.astype(jnp.bfloat16) for w in (w1, w2, w3))
    wg1b, wg2b = wg1.astype(jnp.bfloat16), wg2.astype(jnp.bfloat16)
    b1f, b2f, b3f = (b.astype(jnp.float32) for b in (b1, b2, b3))
    bg1f, bg2f = bg1.astype(jnp.float32), bg2.astype(jnp.float32)

    # Pad the final Cout up to a full 128-lane slab (lane-dense stores):
    # W3 columns zero-padded, bias padded lanes forced to -1e30 so they
    # contribute exp() == 0 to the softmax denominator.
    wg3p = jnp.zeros((d2, LANE), jnp.bfloat16).at[:, :output_dim].set(
        wg3.astype(jnp.bfloat16))
    bg3p = jnp.full((1, LANE), -1e30, jnp.float32).at[:, :output_dim].set(
        bg3.astype(jnp.float32))

    cparams_1d = pltpu.CompilerParams(
        dimension_semantics=("parallel",),
        vmem_limit_bytes=32 * 1024 * 1024)
    cparams_2d = pltpu.CompilerParams(
        dimension_semantics=("parallel", "arbitrary"),
        vmem_limit_bytes=32 * 1024 * 1024)

    def resident1(shape):   # VMEM-resident across a 1-D grid
        return pl.BlockSpec(shape, lambda i: (0, 0))

    def resident2(shape):   # VMEM-resident across a 2-D grid
        return pl.BlockSpec(shape, lambda i, k: (0, 0))

    # Adjacency tile: triple-buffered so the (mem-bound) DMA stays saturated.
    adj_spec = pl.BlockSpec((tile, tile), lambda i, k: (i, k),
                            pipeline_mode=pl.Buffered(3))

    # ---- pointwise conv stack (row-tiled, fully parallel) ----
    # TODO(synk): optionally fuse this into gcn1 to skip the h HBM roundtrip.
    h = pl.pallas_call(
        conv_stack_kernel,
        out_shape=jax.ShapeDtypeStruct((n_pad, c3), jnp.bfloat16),
        grid=(gr,),
        in_specs=[
            pl.BlockSpec((tile, input_dim), lambda i: (i, 0)),
            resident1((input_dim, c1)), resident1((1, c1)),
            resident1((c1, c2)), resident1((1, c2)),
            resident1((c2, c3)), resident1((1, c3)),
        ],
        out_specs=pl.BlockSpec((tile, c3), lambda i: (i, 0)),
        compiler_params=cparams_1d,
    )(x, w1b, b1f, w2b, b2f, w3b, b3f)

    # ---- gcn1: relu((A @ h) @ Wg1 + bg1); h fully VMEM-resident ----
    g1 = pl.pallas_call(
        functools.partial(gcn_hidden_kernel, tile_k=tile),
        out_shape=jax.ShapeDtypeStruct((n_pad, d1), jnp.bfloat16),
        grid=(gr, gk),
        in_specs=[
            adj_spec,
            resident2((n_pad, c3)),               # h: DMA'd once, resident
            resident2((c3, d1)), resident2((1, d1)),
        ],
        out_specs=pl.BlockSpec((tile, d1), lambda i, k: (i, 0)),
        scratch_shapes=[pltpu.VMEM((tile, c3), jnp.float32)],
        compiler_params=cparams_2d,
    )(adj, h, wg1b, bg1f)

    # ---- gcn2 (+ fused lane-padded gcn3 projection):
    #      p = relu((A @ g1) @ Wg2 + bg2) @ Wg3_pad ----
    p = pl.pallas_call(
        functools.partial(gcn_hidden_proj_kernel, tile_k=tile),
        out_shape=jax.ShapeDtypeStruct((n_pad, LANE), jnp.bfloat16),
        grid=(gr, gk),
        in_specs=[
            adj_spec,
            resident2((n_pad, d1)),               # g1: DMA'd once, resident
            resident2((d1, d2)), resident2((1, d2)),
            resident2((d2, LANE)),
        ],
        out_specs=pl.BlockSpec((tile, LANE), lambda i, k: (i, 0)),
        scratch_shapes=[pltpu.VMEM((tile, d1), jnp.float32)],
        compiler_params=cparams_2d,
    )(adj, g1, wg2b, bg2f, wg3p)

    # ---- gcn3 aggregation + bias + softmax (accumulate in the f32 output) ----
    out = pl.pallas_call(
        functools.partial(gcn_final_softmax_kernel, tile_k=tile),
        out_shape=jax.ShapeDtypeStruct((n_pad, LANE), jnp.float32),
        grid=(gr, gk),
        in_specs=[
            adj_spec,
            resident2((n_pad, LANE)),             # p: DMA'd once, resident
            resident2((1, LANE)),
        ],
        out_specs=pl.BlockSpec((tile, LANE), lambda i, k: (i, 0)),
        compiler_params=cparams_2d,
    )(adj, p, bg3p)

    return out[:n, :output_dim]


def reference_forward(x, edge_index, params):
    """Pure-JAX f32 reference of the PyTorch forward."""
    (w1, b1), (w2, b2), (w3, b3), (wg1, bg1), (wg2, bg2), (wg3, bg3) = params
    adj = build_normalized_adj(edge_index, x.shape[0])
    h = jax.nn.relu(x @ w1 + b1)
    h = jax.nn.relu(h @ w2 + b2)
    h = jax.nn.relu(h @ w3 + b3)
    g = jax.nn.relu(adj @ (h @ wg1) + bg1)
    g = jax.nn.relu(adj @ (g @ wg2) + bg2)
    logits = adj @ (g @ wg3) + bg3
    return jax.nn.softmax(logits, axis=-1)


if __name__ == "__main__":
    INPUT_DIM = 8
    OUTPUT_DIM = 16
    N = 1024  # exercises tile=512 with a 2x2 (row, reduction) grid (gr >= 2)

    key = jax.random.PRNGKey(0)
    kx, kp = jax.random.split(key)

    # point-cloud features: (N, input_dim)
    x = jax.random.normal(kx, (N, INPUT_DIM), jnp.float32)

    # simple undirected ring graph as edge_index (2, 2N)
    idx = jnp.arange(N, dtype=jnp.int32)
    nxt = (idx + 1) % N
    edge_index = jnp.stack([jnp.concatenate([idx, nxt]),
                            jnp.concatenate([nxt, idx])], axis=0)

    params = make_params(kp, INPUT_DIM, OUTPUT_DIM)

    out = part_seg2_forward(x, edge_index, params)
    out = jax.block_until_ready(out)

    assert out.shape == (N, OUTPUT_DIM)
    row_sums = jnp.sum(out, axis=1)
    assert bool(jnp.allclose(row_sums, 1.0, atol=1e-2)), \
        float(jnp.max(jnp.abs(row_sums - 1.0)))

    ref = reference_forward(x, edge_index, params)
    max_err = float(jnp.max(jnp.abs(out - ref)))
    assert max_err < 3e-2, max_err

    print("KERNEL_OK")
</pallas_src>

<mosaic_0001>
module attributes {stable_mosaic.version = 11 : i64} {
  func.func @conv_stack_kernel(%arg0: i32, %arg1: memref<512x8xbf16, #tpu.memory_space<vmem>>, %arg2: memref<8x32xbf16, #tpu.memory_space<vmem>>, %arg3: memref<1x32xf32, #tpu.memory_space<vmem>>, %arg4: memref<32x64xbf16, #tpu.memory_space<vmem>>, %arg5: memref<1x64xf32, #tpu.memory_space<vmem>>, %arg6: memref<64x128xbf16, #tpu.memory_space<vmem>>, %arg7: memref<1x128xf32, #tpu.memory_space<vmem>>, %arg8: memref<512x128xbf16, #tpu.memory_space<vmem>>) attributes {dimension_semantics = [#tpu.dimension_semantics<parallel>], iteration_bounds = array<i64: 2>, scalar_prefetch = 0 : i64, scratch_operands = 0 : i64, tpu.core_type = #tpu.core_type<tc>, window_params = [{transform_indices = @transform_0, window_bounds = array<i64: 512, 8>}, {pipeline_mode = #tpu.pipeline_mode<synchronous>, transform_indices = @transform_1, window_bounds = array<i64: 8, 32>}, {pipeline_mode = #tpu.pipeline_mode<synchronous>, transform_indices = @transform_2, window_bounds = array<i64: 1, 32>}, {pipeline_mode = #tpu.pipeline_mode<synchronous>, transform_indices = @transform_3, window_bounds = array<i64: 32, 64>}, {pipeline_mode = #tpu.pipeline_mode<synchronous>, transform_indices = @transform_4, window_bounds = array<i64: 1, 64>}, {pipeline_mode = #tpu.pipeline_mode<synchronous>, transform_indices = @transform_5, window_bounds = array<i64: 64, 128>}, {pipeline_mode = #tpu.pipeline_mode<synchronous>, transform_indices = @transform_6, window_bounds = array<i64: 1, 128>}, {transform_indices = @transform_7, window_bounds = array<i64: 512, 128>}]} {
    %c0 = arith.constant 0 : index
    %c0_0 = arith.constant 0 : index
    %0 = vector.load %arg1[%c0, %c0_0] : memref<512x8xbf16, #tpu.memory_space<vmem>>, vector<512x8xbf16>
    %c0_1 = arith.constant 0 : index
    %c0_2 = arith.constant 0 : index
    %1 = vector.load %arg2[%c0_1, %c0_2] : memref<8x32xbf16, #tpu.memory_space<vmem>>, vector<8x32xbf16>
    %cst = arith.constant dense<0.000000e+00> : vector<512x32xf32>
    %2 = tpu.matmul %0, %1, %cst {dimension_numbers = #tpu.dot_dimension_numbers<[1], [0], [0], [1], [0, 0, 1, 1], [], []>} : vector<512x8xbf16>, vector<8x32xbf16>, vector<512x32xf32> -> vector<512x32xf32>
    %c0_3 = arith.constant 0 : index
    %c0_4 = arith.constant 0 : index
    %3 = vector.load %arg3[%c0_3, %c0_4] : memref<1x32xf32, #tpu.memory_space<vmem>>, vector<1x32xf32>
    %4 = vector.broadcast %3 : vector<1x32xf32> to vector<512x32xf32>
    %5 = arith.addf %2, %4 : vector<512x32xf32>
    %cst_5 = arith.constant 0.000000e+00 : f32
    %6 = vector.broadcast %cst_5 : f32 to vector<512x32xf32>
    %7 = arith.maximumf %5, %6 : vector<512x32xf32>
    %8 = arith.truncf %7 : vector<512x32xf32> to vector<512x32xbf16>
    %c0_6 = arith.constant 0 : index
    %c0_7 = arith.constant 0 : index
    %9 = vector.load %arg4[%c0_6, %c0_7] : memref<32x64xbf16, #tpu.memory_space<vmem>>, vector<32x64xbf16>
    %cst_8 = arith.constant dense<0.000000e+00> : vector<512x64xf32>
    %10 = tpu.matmul %8, %9, %cst_8 {dimension_numbers = #tpu.dot_dimension_numbers<[1], [0], [0], [1], [0, 0, 1, 1], [], []>} : vector<512x32xbf16>, vector<32x64xbf16>, vector<512x64xf32> -> vector<512x64xf32>
    %c0_9 = arith.constant 0 : index
    %c0_10 = arith.constant 0 : index
    %11 = vector.load %arg5[%c0_9, %c0_10] : memref<1x64xf32, #tpu.memory_space<vmem>>, vector<1x64xf32>
    %12 = vector.broadcast %11 : vector<1x64xf32> to vector<512x64xf32>
    %13 = arith.addf %10, %12 : vector<512x64xf32>
    %cst_11 = arith.constant 0.000000e+00 : f32
    %14 = vector.broadcast %cst_11 : f32 to vector<512x64xf32>
    %15 = arith.maximumf %13, %14 : vector<512x64xf32>
    %16 = arith.truncf %15 : vector<512x64xf32> to vector<512x64xbf16>
    %c0_12 = arith.constant 0 : index
    %c0_13 = arith.constant 0 : index
    %17 = vector.load %arg6[%c0_12, %c0_13] : memref<64x128xbf16, #tpu.memory_space<vmem>>, vector<64x128xbf16>
    %cst_14 = arith.constant dense<0.000000e+00> : vector<512x128xf32>
    %18 = tpu.matmul %16, %17, %cst_14 {dimension_numbers = #tpu.dot_dimension_numbers<[1], [0], [0], [1], [0, 0, 1, 1], [], []>} : vector<512x64xbf16>, vector<64x128xbf16>, vector<512x128xf32> -> vector<512x128xf32>
    %c0_15 = arith.constant 0 : index
    %c0_16 = arith.constant 0 : index
    %19 = vector.load %arg7[%c0_15, %c0_16] : memref<1x128xf32, #tpu.memory_space<vmem>>, vector<1x128xf32>
    %20 = vector.broadcast %19 : vector<1x128xf32> to vector<512x128xf32>
    %21 = arith.addf %18, %20 : vector<512x128xf32>
    %cst_17 = arith.constant 0.000000e+00 : f32
    %22 = vector.broadcast %cst_17 : f32 to vector<512x128xf32>
    %23 = arith.maximumf %21, %22 : vector<512x128xf32>
    %24 = arith.truncf %23 : vector<512x128xf32> to vector<512x128xbf16>
    %c0_18 = arith.constant 0 : index
    %c0_19 = arith.constant 0 : index
    %25 = vector.load %arg8[%c0_18, %c0_19] : memref<512x128xbf16, #tpu.memory_space<vmem>>, vector<512x128xbf16>
    tpu.vector_store %arg8[%c0_18, %c0_19], %24 {strides = array<i32>} : memref<512x128xbf16, #tpu.memory_space<vmem>>, vector<512x128xbf16>,
    return
  }
  func.func @transform_0(%arg0: i32) -> (i32, i32) {
    %c0_i32 = arith.constant 0 : i32
    %c0_i32_0 = arith.constant 0 : i32
    return %arg0, %c0_i32 : i32, i32
  }
  func.func @transform_1(%arg0: i32) -> (i32, i32) {
    %c0_i32 = arith.constant 0 : i32
    %c0_i32_0 = arith.constant 0 : i32
    %c0_i32_1 = arith.constant 0 : i32
    return %c0_i32, %c0_i32_0 : i32, i32
  }
  func.func @transform_2(%arg0: i32) -> (i32, i32) {
    %c0_i32 = arith.constant 0 : i32
    %c0_i32_0 = arith.constant 0 : i32
    %c0_i32_1 = arith.constant 0 : i32
    return %c0_i32, %c0_i32_0 : i32, i32
  }
  func.func @transform_3(%arg0: i32) -> (i32, i32) {
    %c0_i32 = arith.constant 0 : i32
    %c0_i32_0 = arith.constant 0 : i32
    %c0_i32_1 = arith.constant 0 : i32
    return %c0_i32, %c0_i32_0 : i32, i32
  }
  func.func @transform_4(%arg0: i32) -> (i32, i32) {
    %c0_i32 = arith.constant 0 : i32
    %c0_i32_0 = arith.constant 0 : i32
    %c0_i32_1 = arith.constant 0 : i32
    return %c0_i32, %c0_i32_0 : i32, i32
  }
  func.func @transform_5(%arg0: i32) -> (i32, i32) {
    %c0_i32 = arith.constant 0 : i32
    %c0_i32_0 = arith.constant 0 : i32
    %c0_i32_1 = arith.constant 0 : i32
    return %c0_i32, %c0_i32_0 : i32, i32
  }
  func.func @transform_6(%arg0: i32) -> (i32, i32) {
    %c0_i32 = arith.constant 0 : i32
    %c0_i32_0 = arith.constant 0 : i32
    %c0_i32_1 = arith.constant 0 : i32
    return %c0_i32, %c0_i32_0 : i32, i32
  }
  func.func @transform_7(%arg0: i32) -> (i32, i32) {
    %c0_i32 = arith.constant 0 : i32
    %c0_i32_0 = arith.constant 0 : i32
    return %arg0, %c0_i32 : i32, i32
  }
}

</mosaic_0001>

<bundles_post_ra>
// kernel: tpu_custom_call.1
= control target key start
LH: loop header
LB: loop body
LE: loop exit
PB: predicated region body
PF: predicated region fallthrough
CT: control target
= control target key end

     0   :  { %12 = vsyncpa [#allocation3], 0  ;;  %s2978_s0 = inlined_call_operand.vmem [shape: bf16[1024,8], index: 0, kind: input, shape index: {}]   ;;  %s2979_s1 = inlined_call_operand.vmem [shape: bf16[8,32], index: 1, kind: input, shape index: {}]   ;;  %s2980_s2 = inlined_call_operand.vmem [shape: f32[1,32], index: 2, kind: input, shape index: {}]   ;;  %s2981_s3 = inlined_call_operand.vmem [shape: bf16[32,64], index: 3, kind: input, shape index: {}]   ;;  %s2982_s4 = inlined_call_operand.vmem [shape: f32[1,64], index: 4, kind: input, shape index: {}]   ;;  %s2983_s5 = inlined_call_operand.vmem [shape: bf16[64,128], index: 5, kind: input, shape index: {}]   ;;  %s2984_s6 = inlined_call_operand.vmem [shape: f32[1,128], index: 6, kind: input, shape index: {}]   ;;  %s2985_s7 = inlined_call_operand.hbm [shape: bf16[1024,128], index: 7, kind: output, shape index: {}]  }
   0x1   :  { %14 = vsyncpa [#allocation3 + $0x1], 0  ;;  %s2480_s24 = smov 0   ;;  %s2482_s25 = smov 0  }
   0x2   :  { %s2484_s26 = smov 0   ;;  %s2486_s27 = smov 0  }
   0x3 LB: > { %s2501_s28 = sadd.s32 4294967295, %s2436_s27   ;;  %s1830_s29 = sadd.s32 4294967294, %s2436_s27   ;;  %s2436_s27 = sphi %s2486_s27, %s2991_s27   ;;  %s2432_s26 = sphi %s2484_s26, %s2990_s26   ;;  %s2428_s25 = sphi %s2482_s25, %s2989_s25   ;;  %s2424_s24 = sphi %s2480_s24, %s2988_s24  }
   0x4   : > { %s2505_s30 = sadd.s32 1, %s2436_s27   ;;  %s179_s8 = sadd.s32 1, %s2432_s26 }
   0x5   : > { %s176_s9 = ssub.s32 %s2436_s27, %s2505_s30  ;;  %p189_p0 = scmp.ne.s32.totalorder %s2432_s26, %s2428_s25 }
   0x6   : > { %p177_p1 = scmp.eq.s32.totalorder %s176_s9, 0  ;;  %p190_p2 = scmp.eq.s32.totalorder %s2501_s28, 1 }
   0x7   : > { %p195_p3 = scmp.ne.s32.totalorder %s2428_s25, %s2424_s24  ;;  %p196_p4 = scmp.eq.s32.totalorder %s1830_s29, 1 }
   0x8   : > { %s2516_s10 = scalar_select %p177_p1, %s2432_s26, %s179_s8  }
   0x9   : > { %p2518_p5 = por %p190_p2, %p189_p0  ;;  %p2522_p6 = por %p196_p4, %p195_p3 }
   0xa   : > { %p1833_p7 = scmp.ge.s32.totalorder %s2436_s27, 1  ;;  %p241_p8 = scmp.lt.s32.totalorder %s2436_s27, 3 }
   0xc   : > { %p242_p9 = pnand %p1833_p7, %p241_p8 }
   0xd   : > { %s1835_s15 = sshll.u32 (!%p242_p9), %s2501_s28, 6  ;;  %s270_s8 = sand.u32 (!%p242_p9), 1, %s2428_s25  }
   0xe   : > { %245 = sbr.rel (%p242_p9) target bundleno = 956 (0x3bc), region = 48  ;;  %p274_p10 = scmp.lt.s32.totalorder (!%p242_p9), %s1835_s15, 127 }
   0xf   : > { %s1834_s9 = sshll.u32 (!%p242_p9), %s270_s8, 8  ;;  %s2128_s20 = sshll.u32 (!%p242_p9), %s2501_s28, 8 }
  0x10   : > { %s2737_s13 = scalar_lea.vmem (!%p242_p9), [#allocation2], %s1834_s9  ;;  %s1764_s23 = scalar_lea.hbm (!%p242_p9), %s2985_s7, %s2128_s20 }
  0x11   : > { %s1765_s29 = sshll.u32 (!%p242_p9), %s2737_s13, 4  ;;  %s1767_s9 = sshll.u32 (!%p242_p9), %s1764_s23, 4  ;;  %s1766_s29 = int_to_ptr.vmem [resolvable:$true] %s1765_s29  ;;  %s1768_s9 = int_to_ptr.hbm [resolvable:$true] %s1767_s9 }
  0x12   : > { %s2388_s14 = sshra.s32 (!%p242_p9), %s1768_s9, 4  ;;  %s2394_s17 = scalar_lea.hbm (!%p242_p9), %s2985_s7, 512  ;;  %s2389_s14 = int_to_ptr.hbm [resolvable:$true] %s2388_s14 }
  0x13   : > { %v345_v0 = vld [vmem:[%s2979_s1] sm:$0xf]  ;;  %vm607_vm0 = vcmask 1043456   ;;  %s2993_s15 = smov (!%p274_p10, %s1835_s15), 127  ;;  %vm510_vm1 = vcmask 64512   ;;  %v2123_v9 = vld [vmem:[%s2981_s3 + $0x8] sm:$0xff]  ;;  %p2395_p0 = scmp.lt.s32.totalorder %s2389_s14, %s2985_s7 }
  0x14   : > { %v609_v1 = vsel %vm607_vm0, %v345_v0, 0  ;;  %s1836_s16 = sshll.u32 %s2993_s15, 2  ;;  %999 = vmatpush.bf16.msra.mxu1 %v2123_v9  ;;  %v2122_v10 = vld [vmem:[%s2981_s3] sm:$0xff]  ;;  %vm896_vm2 = vcmask 261120   ;;  %vm1294_vm3 = vcmask 523264   ;;  %s2390_s28 = scalar_lea.hbm %s2389_s14, 256 }
  0x15   : > { %618 = vmatpush.bf16.msra.mxu0 %v609_v1  ;;  %2320 = vmatpush.bf16.msra.mxu3 %v609_v1  ;;  %s2535_s19 = scalar_lea.vmem %s2978_s0, %s1836_s16  ;;  %v2563_v14 = vld [vmem:[%s2980_s2] ss:$0 sm:$0xff]  ;;  %p2391_p11 = scmp.ne.s32.totalorder %s2389_s14, %s2390_s28 }
  0x16   : > { %v2090_v2 = vld [vmem:[%s2535_s19] sm:$0xff]  ;;  %v2091_v3 = vld [vmem:[%s2535_s19 + $0x8] sm:$0xff]  ;;  %v2092_v4 = vld [vmem:[%s2535_s19 + $0x10] sm:$0xff]  ;;  %p2396_p1 = scmp.lt.s32.totalorder %s2394_s17, %s2390_s28 }
  0x17   : > { %v2093_v5 = vld [vmem:[%s2535_s19 + $0x18] sm:$0xff]  ;;  %v2094_v6 = vld [vmem:[%s2535_s19 + $0x20] sm:$0xff]  ;;  %v2095_v7 = vld [vmem:[%s2535_s19 + $0x28] sm:$0xff]  ;;  %p2392_p12 = pnand %p2391_p11, %p2518_p5 }
  0x18   : > { %1965 = vmatmul.msk.bf16.vlgmr.msra.gmra.mxu0 %vm510_vm1, %v2090_v2  ;;  %v2096_v8 = vld [vmem:[%s2535_s19 + $0x30] sm:$0xff]  ;;  %1000 = vmatpush.bf16.msra.mxu1 %v2122_v10  ;;  %v2097_v11 = vld [vmem:[%s2535_s19 + $0x38] sm:$0xff]  ;;  %v2098_v12 = vld [vmem:[%s2535_s19 + $0x40] sm:$0xff]  ;;  %p2397_p2 = por %p2396_p1, %p2395_p0 }
  0x19   : > { %2321 = vmatpush.bf16.msrb.mxu3 %v2123_v9  ;;  %v2099_v21 = vld [vmem:[%s2535_s19 + $0x48] sm:$0xff]  ;;  %v2100_v29 = vld [vmem:[%s2535_s19 + $0x50] sm:$0xff]  ;;  %v2101_v37 = vld [vmem:[%s2535_s19 + $0x58] sm:$0xff]  ;;  %p2393_p13 = pneg %p2392_p12 }
  0x1a   : > { %v2102_v45 = vld [vmem:[%s2535_s19 + $0x60] sm:$0xff]  ;;  %v2103_v53 = vld [vmem:[%s2535_s19 + $0x68] sm:$0xff]  ;;  %v2104_v61 = vld [vmem:[%s2535_s19 + $0x70] sm:$0xff] }
  0x1b   : > { %v2601_v2 = vld [vmem:[%s2983_s5 + $0x18] sm:$0xff]  ;;  %v2615_v9 = vld [vmem:[%s2983_s5 + $0x8] sm:$0xff]  ;;  %p2398_p3 = pnand %p2397_p2, %p2393_p13 }
  0x1c   : > { %1395 = vmatpush.bf16.msra.mxu2 %v2601_v2 }
  0x1d   : > { %2322 = vmatpush.bf16.msrb.mxu3 %v2122_v10  ;;  %v2622_v10 = vld [vmem:[%s2983_s5] sm:$0xff] }
  0x28   : > { %1966 = vmatmul.msk.bf16.gmra.mxu0 %vm510_vm1, %v2091_v3 }
  0x38   : > { %1967 = vmatmul.msk.bf16.gmra.mxu0 %vm510_vm1, %v2092_v4 }
  0x48   : > { %1968 = vmatmul.msk.bf16.gmra.mxu0 %vm510_vm1, %v2093_v5 }
  0x58   : > { %1969 = vmatmul.msk.bf16.gmra.mxu0 %vm510_vm1, %v2094_v6  ;;  %v2607_v6 = vld [vmem:[%s2983_s5 + $0x10] sm:$0xff] }
  0x59   : > { %1396 = vmatpush.bf16.msra.mxu2 %v2607_v6 }
  0x5d   : > { %1397 = vmatpush.bf16.msra.mxu2 %v2615_v9 }
  0x61   : > { %1398 = vmatpush.bf16.msra.mxu2 %v2622_v10 }
  0x68   : > { %1970 = vmatmul.msk.bf16.gmra.mxu0 %vm510_vm1, %v2095_v7  ;;  %v2105_v7 = vld [vmem:[%s2535_s19 + $0x78] sm:$0xff] }
  0x78   : > { %1971 = vmatmul.msk.bf16.gmra.mxu0 %vm510_vm1, %v2096_v8 }
  0x88   : > { %1972 = vmatmul.msk.bf16.gmra.mxu0 %vm510_vm1, %v2097_v11 }
  0x95   : > { %v620_v13 = vpop.f32.mrf.mxu0 }
  0x96   : > { %v621_v15 = vadd.f32 %v2563_v14, %v620_v13 }
  0x98   : > { %1973 = vmatmul.msk.bf16.gmra.mxu0 %vm510_vm1, %v2098_v12  ;;  %v780_v18 = vmax.f32 %v621_v15, 0.0 }
  0x9d   : > { %v622_v16 = vpop.f32.mrf.mxu0 }
  0x9e   : > { %v623_v17 = vadd.f32 %v2563_v14, %v622_v16 }
  0xa0   : > { %v781_v19 = vmax.f32 %v623_v17, 0.0 }
  0xa2   : > { %v844_v20 = vpack.c.bf16 %v781_v19, %v780_v18  ;;  %v2106_v18 = vld [vmem:[%s2535_s19 + $0x80] sm:$0xff] }
  0xa4   : > { %2005 = vmatmul.msk.bf16.vlgmr.msra.gmra.mxu1 %vm896_vm2, %v844_v20 }
  0xa5   : > { %v625_v22 = vpop.f32.mrf.mxu0 }
  0xa6   : > { %v626_v23 = vadd.f32 %v2563_v14, %v625_v22 }
  0xa8   : > { %1974 = vmatmul.msk.bf16.gmra.mxu0 %vm510_vm1, %v2099_v21  ;;  %v782_v26 = vmax.f32 %v626_v23, 0.0 }
  0xad   : > { %v627_v24 = vpop.f32.mrf.mxu0 }
  0xae   : > { %v628_v25 = vadd.f32 %v2563_v14, %v627_v24 }
  0xb0   : > { %v783_v27 = vmax.f32 %v628_v25, 0.0 }
  0xb2   : > { %v845_v28 = vpack.c.bf16 %v783_v27, %v782_v26  ;;  %v2635_v27 = vld [vmem:[%s2982_s4] ss:$0 sm:$0xff] }
  0xb4   : > { %2006 = vmatmul.msk.bf16.gmra.mxu1 %vm896_vm2, %v845_v28  ;;  %v2107_v28 = vld [vmem:[%s2535_s19 + $0x88] sm:$0xff] }
  0xb5   : > { %v630_v30 = vpop.f32.mrf.mxu0 }
  0xb6   : > { %v631_v31 = vadd.f32 %v2563_v14, %v630_v30 }
  0xb8   : > { %1975 = vmatmul.msk.bf16.gmra.mxu0 %vm510_vm1, %v2100_v29  ;;  %v784_v34 = vmax.f32 %v631_v31, 0.0 }
  0xbd   : > { %v632_v32 = vpop.f32.mrf.mxu0 }
  0xbe   : > { %v633_v33 = vadd.f32 %v2563_v14, %v632_v32 }
  0xc0   : > { %v785_v35 = vmax.f32 %v633_v33, 0.0 }
  0xc2   : > { %v846_v36 = vpack.c.bf16 %v785_v35, %v784_v34 }
  0xc4   : > { %2007 = vmatmul.msk.bf16.gmra.mxu1 %vm896_vm2, %v846_v36 }
  0xc5   : > { %v635_v38 = vpop.f32.mrf.mxu0 }
  0xc6   : > { %v636_v39 = vadd.f32 %v2563_v14, %v635_v38 }
  0xc8   : > { %1976 = vmatmul.msk.bf16.gmra.mxu0 %vm510_vm1, %v2101_v37  ;;  %v786_v42 = vmax.f32 %v636_v39, 0.0 }
  0xcd   : > { %v637_v40 = vpop.f32.mrf.mxu0 }
  0xce   : > { %v638_v41 = vadd.f32 %v2563_v14, %v637_v40 }
  0xd0   : > { %v787_v43 = vmax.f32 %v638_v41, 0.0 }
  0xd2   : > { %v847_v44 = vpack.c.bf16 %v787_v43, %v786_v42  ;;  %v2108_v43 = vld [vmem:[%s2535_s19 + $0x90] sm:$0xff] }
  0xd4   : > { %2008 = vmatmul.msk.bf16.gmra.mxu1 %vm896_vm2, %v847_v44 }
  0xd5   : > { %v640_v46 = vpop.f32.mrf.mxu0 }
  0xd6   : > { %v641_v47 = vadd.f32 %v2563_v14, %v640_v46 }
  0xd8   : > { %1977 = vmatmul.msk.bf16.gmra.mxu0 %vm510_vm1, %v2102_v45  ;;  %v788_v50 = vmax.f32 %v641_v47, 0.0 }
  0xdd   : > { %v642_v48 = vpop.f32.mrf.mxu0 }
  0xde   : > { %v643_v49 = vadd.f32 %v2563_v14, %v642_v48 }
  0xe0   : > { %v789_v51 = vmax.f32 %v643_v49, 0.0 }
  0xe2   : > { %v848_v52 = vpack.c.bf16 %v789_v51, %v788_v50 }
  0xe4   : > { %2009 = vmatmul.msk.bf16.gmra.mxu1 %vm896_vm2, %v848_v52 }
  0xe5   : > { %v645_v54 = vpop.f32.mrf.mxu0 }
  0xe6   : > { %v646_v55 = vadd.f32 %v2563_v14, %v645_v54 }
  0xe8   : > { %1978 = vmatmul.msk.bf16.gmra.mxu0 %vm510_vm1, %v2103_v53  ;;  %v790_v58 = vmax.f32 %v646_v55, 0.0 }
  0xed   : > { %v647_v56 = vpop.f32.mrf.mxu0 }
  0xee   : > { %v648_v57 = vadd.f32 %v2563_v14, %v647_v56 }
  0xf0   : > { %v791_v59 = vmax.f32 %v648_v57, 0.0 }
  0xf2   : > { %v849_v60 = vpack.c.bf16 %v791_v59, %v790_v58  ;;  %v2109_v58 = vld [vmem:[%s2535_s19 + $0x98] sm:$0xff] }
  0xf4   : > { %2010 = vmatmul.msk.bf16.gmra.mxu1 %vm896_vm2, %v849_v60 }
  0xf5   : > { %v650_v62 = vpop.f32.mrf.mxu0 }
  0xf6   : > { %v651_v63 = vadd.f32 %v2563_v14, %v650_v62 }
  0xf8   : > { %1979 = vmatmul.msk.bf16.gmra.mxu0 %vm510_vm1, %v2104_v61  ;;  %v792_v3 = vmax.f32 %v651_v63, 0.0 }
  0xfd   : > { %v652_v0 = vpop.f32.mrf.mxu0 }
  0xfe   : > { %v653_v1 = vadd.f32 %v2563_v14, %v652_v0 }
 0x100   : > { %v793_v4 = vmax.f32 %v653_v1, 0.0 }
 0x102   : > { %v850_v5 = vpack.c.bf16 %v793_v4, %v792_v3 }
 0x104   : > { %2011 = vmatmul.msk.bf16.gmra.mxu1 %vm896_vm2, %v850_v5 }
 0x105   : > { %v655_v8 = vpop.f32.mrf.mxu0 }
 0x106   : > { %v656_v11 = vadd.f32 %v2563_v14, %v655_v8 }
 0x108   : > { %1980 = vmatmul.msk.bf16.gmra.mxu0 %vm510_vm1, %v2105_v7  ;;  %v794_v15 = vmax.f32 %v656_v11, 0.0 }
 0x10d   : > { %v657_v12 = vpop.f32.mrf.mxu0 }
 0x10e   : > { %v658_v13 = vadd.f32 %v2563_v14, %v657_v12 }
 0x110   : > { %v795_v16 = vmax.f32 %v658_v13, 0.0  ;;  %v2110_v13 = vld [vmem:[%s2535_s19 + $0xa0] sm:$0xff] }
 0x112   : > { %v851_v17 = vpack.c.bf16 %v795_v16, %v794_v15 }
 0x114   : > { %2012 = vmatmul.msk.bf16.gmra.mxu1 %vm896_vm2, %v851_v17 }
 0x115   : > { %v660_v19 = vpop.f32.mrf.mxu0 }
 0x116   : > { %v661_v20 = vadd.f32 %v2563_v14, %v660_v19 }
 0x118   : > { %1981 = vmatmul.msk.bf16.gmra.mxu0 %vm510_vm1, %v2106_v18  ;;  %v796_v23 = vmax.f32 %v661_v20, 0.0 }
 0x11d   : > { %v662_v21 = vpop.f32.mrf.mxu0 }
 0x11e   : > { %v663_v22 = vadd.f32 %v2563_v14, %v662_v21 }
 0x120   : > { %v797_v24 = vmax.f32 %v663_v22, 0.0 }
 0x121   : > { %v1002_v25 = vpop.f32.mrf.mxu1 }
 0x122   : > { %v852_v26 = vpack.c.bf16 %v797_v24, %v796_v23  ;;  %v1003_v30 = vadd.f32 %v2635_v27, %v1002_v25 }
 0x124   : > { %2013 = vmatmul.msk.bf16.gmra.mxu1 %vm896_vm2, %v852_v26  ;;  %v1162_v33 = vmax.f32 %v1003_v30, 0.0  ;;  %v2111_v30 = vld [vmem:[%s2535_s19 + $0xa8] sm:$0xff] }
 0x125   : > { %v665_v29 = vpop.f32.mrf.mxu0 }
 0x126   : > { %v666_v34 = vadd.f32 %v2563_v14, %v665_v29 }
 0x128   : > { %1982 = vmatmul.msk.bf16.gmra.mxu0 %vm510_vm1, %v2107_v28  ;;  %v798_v39 = vmax.f32 %v666_v34, 0.0 }
 0x129   : > { %v1004_v31 = vpop.f32.mrf.mxu1 }
 0x12a   : > { %v1005_v32 = vadd.f32 %v2635_v27, %v1004_v31 }
 0x12c   : > { %v1163_v35 = vmax.f32 %v1005_v32, 0.0 }
 0x12d   : > { %v667_v36 = vpop.f32.mrf.mxu0 }
 0x12e   : > { %v668_v37 = vadd.f32 %v2563_v14, %v667_v36  ;;  %v1226_v38 = vpack.c.bf16 %v1163_v35, %v1162_v33 }
 0x130   : > { %v799_v40 = vmax.f32 %v668_v37, 0.0  ;;  %2053 = vmatmul.msk.bf16.vlgmr.msra.gmra.mxu2 %vm1294_vm3, %v1226_v38 }
 0x131   : > { %v1007_v41 = vpop.f32.mrf.mxu1 }
 0x132   : > { %v853_v42 = vpack.c.bf16 %v799_v40, %v798_v39  ;;  %v1008_v45 = vadd.f32 %v2635_v27, %v1007_v41 }
 0x134   : > { %2014 = vmatmul.msk.bf16.gmra.mxu1 %vm896_vm2, %v853_v42  ;;  %v1164_v48 = vmax.f32 %v1008_v45, 0.0  ;;  %v2112_v45 = vld [vmem:[%s2535_s19 + $0xb0] sm:$0xff] }
 0x135   : > { %v670_v44 = vpop.f32.mrf.mxu0 }
 0x136   : > { %v671_v49 = vadd.f32 %v2563_v14, %v670_v44 }
 0x138   : > { %1983 = vmatmul.msk.bf16.gmra.mxu0 %vm510_vm1, %v2108_v43  ;;  %v800_v54 = vmax.f32 %v671_v49, 0.0 }
 0x139   : > { %v1009_v46 = vpop.f32.mrf.mxu1 }
 0x13a   : > { %v1010_v47 = vadd.f32 %v2635_v27, %v1009_v46 }
 0x13c   : > { %v1165_v50 = vmax.f32 %v1010_v47, 0.0 }
 0x13d   : > { %v672_v51 = vpop.f32.mrf.mxu0 }
 0x13e   : > { %v673_v52 = vadd.f32 %v2563_v14, %v672_v51  ;;  %v1227_v53 = vpack.c.bf16 %v1165_v50, %v1164_v48  ;;  %v2115_v48 = vld [vmem:[%s2535_s19 + $0xc8] sm:$0xff] }
 0x13f   : > { %1990 = vmatmul.msk.bf16.vlgmr.msra.gmra.mxu3 %vm510_vm1, %v2115_v48  ;;  %v2723_v48 = vld [vmem:[%s2984_s6] ss:$0 sm:$0xff] }
 0x140   : > { %v801_v55 = vmax.f32 %v673_v52, 0.0  ;;  %2054 = vmatmul.msk.bf16.gmra.mxu2 %vm1294_vm3, %v1227_v53  ;;  %2323 = vmatpush.bf16.msra.mxu3 %v2601_v2  ;;  %v2113_v2 = vld [vmem:[%s2535_s19 + $0xb8] sm:$0xff] }
 0x141   : > { %v1012_v56 = vpop.f32.mrf.mxu1 }
 0x142   : > { %v854_v57 = vpack.c.bf16 %v801_v55, %v800_v54  ;;  %v1013_v60 = vadd.f32 %v2635_v27, %v1012_v56 }
 0x144   : > { %2015 = vmatmul.msk.bf16.gmra.mxu1 %vm896_vm2, %v854_v57  ;;  %v1166_v63 = vmax.f32 %v1013_v60, 0.0  ;;  %2324 = vmatpush.bf16.msra.mxu3 %v2607_v6 }
 0x145   : > { %v675_v59 = vpop.f32.mrf.mxu0 }
 0x146   : > { %v676_v0 = vadd.f32 %v2563_v14, %v675_v59 }
 0x148   : > { %1984 = vmatmul.msk.bf16.gmra.mxu0 %vm510_vm1, %v2109_v58  ;;  %v802_v7 = vmax.f32 %v676_v0, 0.0  ;;  %2325 = vmatpush.bf16.msra.mxu3 %v2615_v9 }
 0x149   : > { %v1014_v61 = vpop.f32.mrf.mxu1 }
 0x14a   : > { %v1015_v62 = vadd.f32 %v2635_v27, %v1014_v61 }
 0x14c   : > { %v1167_v1 = vmax.f32 %v1015_v62, 0.0  ;;  %2326 = vmatpush.bf16.msra.mxu3 %v2622_v10 }
 0x14d   : > { %v677_v3 = vpop.f32.mrf.mxu0 }
 0x14e   : > { %v678_v4 = vadd.f32 %v2563_v14, %v677_v3  ;;  %v1228_v5 = vpack.c.bf16 %v1167_v1, %v1166_v63  ;;  %v2116_v63 = vld [vmem:[%s2535_s19 + $0xd0] sm:$0xff] }
 0x14f   : > { %1991 = vmatmul.msk.bf16.gmra.mxu3 %vm510_vm1, %v2116_v63 }
 0x150   : > { %v803_v8 = vmax.f32 %v678_v4, 0.0  ;;  %2055 = vmatmul.msk.bf16.gmra.mxu2 %vm1294_vm3, %v1228_v5 }
 0x151   : > { %v1017_v11 = vpop.f32.mrf.mxu1 }
 0x152   : > { %v855_v12 = vpack.c.bf16 %v803_v8, %v802_v7  ;;  %v1018_v16 = vadd.f32 %v2635_v27, %v1017_v11 }
 0x154   : > { %2016 = vmatmul.msk.bf16.gmra.mxu1 %vm896_vm2, %v855_v12  ;;  %v1168_v19 = vmax.f32 %v1018_v16, 0.0 }
 0x155   : > { %v680_v15 = vpop.f32.mrf.mxu0 }
 0x156   : > { %v681_v20 = vadd.f32 %v2563_v14, %v680_v15 }
 0x158   : > { %1985 = vmatmul.msk.bf16.gmra.mxu0 %vm510_vm1, %v2110_v13  ;;  %v804_v25 = vmax.f32 %v681_v20, 0.0  ;;  %v2114_v13 = vld [vmem:[%s2535_s19 + $0xc0] sm:$0xff] }
 0x159   : > { %v1019_v17 = vpop.f32.mrf.mxu1 }
 0x15a   : > { %v1020_v18 = vadd.f32 %v2635_v27, %v1019_v17  ;;  %v2117_v17 = vld [vmem:[%s2535_s19 + $0xd8] sm:$0xff] }
 0x15c   : > { %v1169_v21 = vmax.f32 %v1020_v18, 0.0 }
 0x15d   : > { %v682_v22 = vpop.f32.mrf.mxu0 }
 0x15e   : > { %v683_v23 = vadd.f32 %v2563_v14, %v682_v22  ;;  %v1229_v24 = vpack.c.bf16 %v1169_v21, %v1168_v19 }
 0x15f   : > { %1992 = vmatmul.msk.bf16.gmra.mxu3 %vm510_vm1, %v2117_v17 }
 0x160   : > { %v805_v26 = vmax.f32 %v683_v23, 0.0  ;;  %2056 = vmatmul.msk.bf16.gmra.mxu2 %vm1294_vm3, %v1229_v24 }
 0x161   : > { %v1022_v28 = vpop.f32.mrf.mxu1 }
 0x162   : > { %v856_v29 = vpack.c.bf16 %v805_v26, %v804_v25  ;;  %v1023_v32 = vadd.f32 %v2635_v27, %v1022_v28 }
 0x164   : > { %2017 = vmatmul.msk.bf16.gmra.mxu1 %vm896_vm2, %v856_v29  ;;  %v1170_v35 = vmax.f32 %v1023_v32, 0.0 }
 0x165   : > { %v685_v31 = vpop.f32.mrf.mxu0 }
 0x166   : > { %v686_v36 = vadd.f32 %v2563_v14, %v685_v31 }
 0x168   : > { %1986 = vmatmul.msk.bf16.gmra.mxu0 %vm510_vm1, %v2111_v30  ;;  %v806_v41 = vmax.f32 %v686_v36, 0.0 }
 0x169   : > { %v1024_v33 = vpop.f32.mrf.mxu1 }
 0x16a   : > { %v1025_v34 = vadd.f32 %v2635_v27, %v1024_v33  ;;  %v2118_v33 = vld [vmem:[%s2535_s19 + $0xe0] sm:$0xff] }
 0x16c   : > { %v1171_v37 = vmax.f32 %v1025_v34, 0.0 }
 0x16d   : > { %v687_v38 = vpop.f32.mrf.mxu0 }
 0x16e   : > { %v688_v39 = vadd.f32 %v2563_v14, %v687_v38  ;;  %v1230_v40 = vpack.c.bf16 %v1171_v37, %v1170_v35 }
 0x16f   : > { %1993 = vmatmul.msk.bf16.gmra.mxu3 %vm510_vm1, %v2118_v33 }
 0x170   : > { %v807_v42 = vmax.f32 %v688_v39, 0.0  ;;  %2057 = vmatmul.msk.bf16.gmra.mxu2 %vm1294_vm3, %v1230_v40 }
 0x171   : > { %v1027_v43 = vpop.f32.mrf.mxu1 }
 0x172   : > { %v857_v44 = vpack.c.bf16 %v807_v42, %v806_v41  ;;  %v1028_v47 = vadd.f32 %v2635_v27, %v1027_v43 }
 0x174   : > { %2018 = vmatmul.msk.bf16.gmra.mxu1 %vm896_vm2, %v857_v44  ;;  %v1172_v51 = vmax.f32 %v1028_v47, 0.0 }
 0x175   : > { %v690_v46 = vpop.f32.mrf.mxu0 }
 0x176   : > { %v691_v52 = vadd.f32 %v2563_v14, %v690_v46 }
 0x178   : > { %1987 = vmatmul.msk.bf16.gmra.mxu0 %vm510_vm1, %v2112_v45  ;;  %v808_v57 = vmax.f32 %v691_v52, 0.0 }
 0x179   : > { %v1029_v49 = vpop.f32.mrf.mxu1 }
 0x17a   : > { %v1030_v50 = vadd.f32 %v2635_v27, %v1029_v49 }
 0x17c   : > { %v1173_v53 = vmax.f32 %v1030_v50, 0.0  ;;  %v2119_v50 = vld [vmem:[%s2535_s19 + $0xe8] sm:$0xff] }
 0x17d   : > { %v692_v54 = vpop.f32.mrf.mxu0 }
 0x17e   : > { %v693_v55 = vadd.f32 %v2563_v14, %v692_v54  ;;  %v1231_v56 = vpack.c.bf16 %v1173_v53, %v1172_v51 }
 0x17f   : > { %1994 = vmatmul.msk.bf16.gmra.mxu3 %vm510_vm1, %v2119_v50 }
 0x180   : > { %v809_v58 = vmax.f32 %v693_v55, 0.0  ;;  %2058 = vmatmul.msk.bf16.gmra.mxu2 %vm1294_vm3, %v1231_v56 }
 0x181   : > { %v1032_v59 = vpop.f32.mrf.mxu1 }
 0x182   : > { %v858_v60 = vpack.c.bf16 %v809_v58, %v808_v57  ;;  %v1033_v62 = vadd.f32 %v2635_v27, %v1032_v59 }
 0x184   : > { %2019 = vmatmul.msk.bf16.gmra.mxu1 %vm896_vm2, %v858_v60  ;;  %v1174_v1 = vmax.f32 %v1033_v62, 0.0 }
 0x185   : > { %v695_v61 = vpop.f32.mrf.mxu0 }
 0x186   : > { %v696_v9 = vadd.f32 %v2563_v14, %v695_v61 }
 0x188   : > { %1988 = vmatmul.msk.bf16.gmra.mxu0 %vm510_vm1, %v2113_v2  ;;  %v810_v7 = vmax.f32 %v696_v9, 0.0 }
 0x189   : > { %v1034_v6 = vpop.f32.mrf.mxu1 }
 0x18a   : > { %v1035_v0 = vadd.f32 %v2635_v27, %v1034_v6 }
 0x18c   : > { %v1175_v3 = vmax.f32 %v1035_v0, 0.0 }
 0x18d   : > { %v697_v4 = vpop.f32.mrf.mxu0 }
 0x18e   : > { %v698_v5 = vadd.f32 %v2563_v14, %v697_v4  ;;  %v1232_v10 = vpack.c.bf16 %v1175_v3, %v1174_v1 }
 0x190   : > { %v811_v8 = vmax.f32 %v698_v5, 0.0  ;;  %2059 = vmatmul.msk.bf16.gmra.mxu2 %vm1294_vm3, %v1232_v10  ;;  %v2120_v10 = vld [vmem:[%s2535_s19 + $0xf0] sm:$0xff] }
 0x191   : > { %v1037_v11 = vpop.f32.mrf.mxu1  ;;  %1995 = vmatmul.msk.bf16.gmra.mxu3 %vm510_vm1, %v2120_v10 }
 0x192   : > { %v859_v12 = vpack.c.bf16 %v811_v8, %v810_v7  ;;  %v1038_v16 = vadd.f32 %v2635_v27, %v1037_v11 }
 0x194   : > { %2020 = vmatmul.msk.bf16.gmra.mxu1 %vm896_vm2, %v859_v12  ;;  %v1176_v20 = vmax.f32 %v1038_v16, 0.0 }
 0x195   : > { %v700_v15 = vpop.f32.mrf.mxu0 }
 0x196   : > { %v701_v21 = vadd.f32 %v2563_v14, %v700_v15 }
 0x198   : > { %1989 = vmatmul.msk.bf16.gmra.mxu0 %vm510_vm1, %v2114_v13  ;;  %v812_v26 = vmax.f32 %v701_v21, 0.0 }
 0x199   : > { %v1039_v18 = vpop.f32.mrf.mxu1 }
 0x19a   : > { %v1040_v19 = vadd.f32 %v2635_v27, %v1039_v18 }
 0x19c   : > { %v1177_v22 = vmax.f32 %v1040_v19, 0.0 }
 0x19d   : > { %v702_v23 = vpop.f32.mrf.mxu0 }
 0x19e   : > { %v703_v24 = vadd.f32 %v2563_v14, %v702_v23  ;;  %v1233_v25 = vpack.c.bf16 %v1177_v22, %v1176_v20 }
 0x1a0   : > { %v813_v28 = vmax.f32 %v703_v24, 0.0  ;;  %2060 = vmatmul.msk.bf16.gmra.mxu2 %vm1294_vm3, %v1233_v25 }
 0x1a1   : > { %v1042_v29 = vpop.f32.mrf.mxu1 }
 0x1a2   : > { %v860_v30 = vpack.c.bf16 %v813_v28, %v812_v26  ;;  %v1043_v32 = vadd.f32 %v2635_v27, %v1042_v29 }
 0x1a4   : > { %2021 = vmatmul.msk.bf16.gmra.mxu1 %vm896_vm2, %v860_v30  ;;  %v1178_v36 = vmax.f32 %v1043_v32, 0.0  ;;  %v2121_v32 = vld [vmem:[%s2535_s19 + $0xf8] sm:$0xff]  ;;  %s1753_s19 = scalar_lea.sflag [#allocation3], %s270_s8 }
 0x1a5   : > { %v705_v31 = vpop.f32.mrf.mxu0  ;;  %1996 = vmatmul.msk.bf16.gmra.mxu3 %vm510_vm1, %v2121_v32 }
 0x1a6   : > { %v706_v37 = vadd.f32 %v2563_v14, %v705_v31 }
 0x1a8   : > { %v814_v42 = vmax.f32 %v706_v37, 0.0 }
 0x1a9   : > { %v1044_v34 = vpop.f32.mrf.mxu1 }
 0x1aa   : > { %v1045_v35 = vadd.f32 %v2635_v27, %v1044_v34 }
 0x1ac   : > { %v1179_v38 = vmax.f32 %v1045_v35, 0.0 }
 0x1ad   : > { %v707_v39 = vpop.f32.mrf.mxu0 }
 0x1ae   : > { %v708_v40 = vadd.f32 %v2563_v14, %v707_v39  ;;  %v1234_v41 = vpack.c.bf16 %v1179_v38, %v1178_v36 }
 0x1b0   : > { %v815_v43 = vmax.f32 %v708_v40, 0.0  ;;  %2061 = vmatmul.msk.bf16.gmra.mxu2 %vm1294_vm3, %v1234_v41 }
 0x1b1   : > { %v1047_v44 = vpop.f32.mrf.mxu1 }
 0x1b2   : > { %v861_v45 = vpack.c.bf16 %v815_v43, %v814_v42  ;;  %v1048_v49 = vadd.f32 %v2635_v27, %v1047_v44 }
 0x1b3   : > { %v1400_v46 = vpop.f32.mrf.mxu2 }
 0x1b4   : > { %2022 = vmatmul.msk.bf16.gmra.mxu1 %vm896_vm2, %v861_v45  ;;  %v1401_v52 = vadd.f32 %v2723_v48, %v1400_v46  ;;  %v1180_v55 = vmax.f32 %v1048_v49, 0.0 }
 0x1b5   : > { %v710_v47 = vpop.f32.mrf.mxu0 }
 0x1b6   : > { %v711_v56 = vadd.f32 %v2563_v14, %v710_v47  ;;  %v1560_v60 = vmax.f32 %v1401_v52, 0.0 }
 0x1b8   : > { %v816_v63 = vmax.f32 %v711_v56, 0.0 }
 0x1b9   : > { %v1049_v51 = vpop.f32.mrf.mxu1 }
 0x1ba   : > { %v1050_v53 = vadd.f32 %v2635_v27, %v1049_v51 }
 0x1bb   : > { %v1402_v54 = vpop.f32.mrf.mxu2 }
 0x1bc   : > { %v1181_v57 = vmax.f32 %v1050_v53, 0.0  ;;  %v1403_v58 = vadd.f32 %v2723_v48, %v1402_v54 }
 0x1bd   : > { %v712_v59 = vpop.f32.mrf.mxu0 }
 0x1be   : > { %v1561_v2 = vmax.f32 %v1403_v58, 0.0  ;;  %v713_v61 = vadd.f32 %v2563_v14, %v712_v59  ;;  %v1235_v62 = vpack.c.bf16 %v1181_v57, %v1180_v55 }
 0x1c0   : > { %v2132_v6 = vpack.c.bf16 %v1561_v2, %v1560_v60  ;;  %v817_v0 = vmax.f32 %v713_v61, 0.0  ;;  %2062 = vmatmul.msk.bf16.gmra.mxu2 %vm1294_vm3, %v1235_v62 }
 0x1c1   : > { %v1052_v1 = vpop.f32.mrf.mxu1 }
 0x1c2   : > { %2133 = vst [vmem:[%s2737_s13] sm:$0xff] %v2132_v6   ;;  %v862_v9 = vpack.c.bf16 %v817_v0, %v816_v63  ;;  %v1053_v5 = vadd.f32 %v2635_v27, %v1052_v1 }
 0x1c3   : > { %v1405_v3 = vpop.f32.mrf.mxu2 }
 0x1c4   : > { %2023 = vmatmul.msk.bf16.gmra.mxu1 %vm896_vm2, %v862_v9  ;;  %v1406_v8 = vadd.f32 %v2723_v48, %v1405_v3  ;;  %v1182_v13 = vmax.f32 %v1053_v5, 0.0 }
 0x1c5   : > { %v715_v4 = vpop.f32.mrf.mxu0 }
 0x1c6   : > { %v716_v15 = vadd.f32 %v2563_v14, %v715_v4  ;;  %v1562_v19 = vmax.f32 %v1406_v8, 0.0 }
 0x1c8   : > { %v818_v23 = vmax.f32 %v716_v15, 0.0 }
 0x1c9   : > { %v1054_v7 = vpop.f32.mrf.mxu1 }
 0x1ca   : > { %v1055_v11 = vadd.f32 %v2635_v27, %v1054_v7 }
 0x1cb   : > { %v1407_v12 = vpop.f32.mrf.mxu2 }
 0x1cc   : > { %v1183_v16 = vmax.f32 %v1055_v11, 0.0  ;;  %v1408_v17 = vadd.f32 %v2723_v48, %v1407_v12 }
 0x1cd   : > { %v717_v18 = vpop.f32.mrf.mxu0 }
 0x1ce   : > { %v1563_v20 = vmax.f32 %v1408_v17, 0.0  ;;  %v718_v21 = vadd.f32 %v2563_v14, %v717_v18  ;;  %v1236_v22 = vpack.c.bf16 %v1183_v16, %v1182_v13 }
 0x1d0   : > { %v2137_v24 = vpack.c.bf16 %v1563_v20, %v1562_v19  ;;  %v819_v25 = vmax.f32 %v718_v21, 0.0  ;;  %2063 = vmatmul.msk.bf16.gmra.mxu2 %vm1294_vm3, %v1236_v22 }
 0x1d1   : > { %v1057_v26 = vpop.f32.mrf.mxu1 }
 0x1d2   : > { %2289 = vst [vmem:[%s2737_s13 + $0x8] sm:$0xff] %v2137_v24   ;;  %v863_v28 = vpack.c.bf16 %v819_v25, %v818_v23  ;;  %v1058_v31 = vadd.f32 %v2635_v27, %v1057_v26 }
 0x1d3   : > { %v1410_v29 = vpop.f32.mrf.mxu2 }
 0x1d4   : > { %2024 = vmatmul.msk.bf16.gmra.mxu1 %vm896_vm2, %v863_v28  ;;  %v1411_v34 = vadd.f32 %v2723_v48, %v1410_v29  ;;  %v1184_v37 = vmax.f32 %v1058_v31, 0.0 }
 0x1d5   : > { %v720_v30 = vpop.f32.mrf.mxu0 }
 0x1d6   : > { %v721_v38 = vadd.f32 %v2563_v14, %v720_v30  ;;  %v1564_v42 = vmax.f32 %v1411_v34, 0.0  ;;  %v745_v34 = vpop.f32.mrf.mxu3 }
 0x1d8   : > { %v820_v46 = vmax.f32 %v721_v38, 0.0 }
 0x1d9   : > { %v1059_v33 = vpop.f32.mrf.mxu1 }
 0x1da   : > { %v1060_v35 = vadd.f32 %v2635_v27, %v1059_v33 }
 0x1db   : > { %v1412_v36 = vpop.f32.mrf.mxu2 }
 0x1dc   : > { %v1185_v39 = vmax.f32 %v1060_v35, 0.0  ;;  %v1413_v40 = vadd.f32 %v2723_v48, %v1412_v36 }
 0x1dd   : > { %v722_v41 = vpop.f32.mrf.mxu0 }
 0x1de   : > { %v1565_v43 = vmax.f32 %v1413_v40, 0.0  ;;  %v723_v44 = vadd.f32 %v2563_v14, %v722_v41  ;;  %v1237_v45 = vpack.c.bf16 %v1185_v39, %v1184_v37 }
 0x1e0   : > { %v2142_v47 = vpack.c.bf16 %v1565_v43, %v1564_v42  ;;  %v821_v49 = vmax.f32 %v723_v44, 0.0  ;;  %2064 = vmatmul.msk.bf16.gmra.mxu2 %vm1294_vm3, %v1237_v45 }
 0x1e1   : > { %v1062_v50 = vpop.f32.mrf.mxu1 }
 0x1e2   : > { %2290 = vst [vmem:[%s2737_s13 + $0x10] sm:$0xff] %v2142_v47   ;;  %v864_v51 = vpack.c.bf16 %v821_v49, %v820_v46  ;;  %v1063_v54 = vadd.f32 %v2635_v27, %v1062_v50  ;;  %v747_v50 = vpop.f32.mrf.mxu3 }
 0x1e3   : > { %v1415_v52 = vpop.f32.mrf.mxu2 }
 0x1e4   : > { %2025 = vmatmul.msk.bf16.gmra.mxu1 %vm896_vm2, %v864_v51  ;;  %v1416_v56 = vadd.f32 %v2723_v48, %v1415_v52  ;;  %v1186_v59 = vmax.f32 %v1063_v54, 0.0 }
 0x1e5   : > { %v725_v53 = vpop.f32.mrf.mxu0 }
 0x1e6   : > { %v726_v60 = vadd.f32 %v2563_v14, %v725_v53  ;;  %v1566_v63 = vmax.f32 %v1416_v56, 0.0 }
 0x1e8   : > { %v822_v9 = vmax.f32 %v726_v60, 0.0 }
 0x1e9   : > { %v1064_v55 = vpop.f32.mrf.mxu1 }
 0x1ea   : > { %v1065_v57 = vadd.f32 %v2635_v27, %v1064_v55  ;;  %v750_v60 = vpop.f32.mrf.mxu3 }
 0x1eb   : > { %v1417_v58 = vpop.f32.mrf.mxu2 }
 0x1ec   : > { %v1187_v2 = vmax.f32 %v1065_v57, 0.0  ;;  %v1418_v61 = vadd.f32 %v2723_v48, %v1417_v58 }
 0x1ed   : > { %v727_v62 = vpop.f32.mrf.mxu0 }
 0x1ee   : > { %v1238_v6 = vpack.c.bf16 %v1187_v2, %v1186_v59  ;;  %v1567_v0 = vmax.f32 %v1418_v61, 0.0  ;;  %v728_v1 = vadd.f32 %v2563_v14, %v727_v62 }
 0x1f0   : > { %v2147_v3 = vpack.c.bf16 %v1567_v0, %v1566_v63  ;;  %v823_v4 = vmax.f32 %v728_v1, 0.0  ;;  %2065 = vmatmul.msk.bf16.gmra.mxu2 %vm1294_vm3, %v1238_v6 }
 0x1f1   : > { %v1067_v5 = vpop.f32.mrf.mxu1 }
 0x1f2   : > { %2291 = vst [vmem:[%s2737_s13 + $0x18] sm:$0xff] %v2147_v3   ;;  %v865_v10 = vpack.c.bf16 %v823_v4, %v822_v9  ;;  %v1068_v11 = vadd.f32 %v2635_v27, %v1067_v5 }
 0x1f3   : > { %v1420_v7 = vpop.f32.mrf.mxu2 }
 0x1f4   : > { %2026 = vmatmul.msk.bf16.gmra.mxu1 %vm896_vm2, %v865_v10  ;;  %v1421_v13 = vadd.f32 %v2723_v48, %v1420_v7  ;;  %v1188_v17 = vmax.f32 %v1068_v11, 0.0 }
 0x1f5   : > { %v730_v8 = vpop.f32.mrf.mxu0 }
 0x1f6   : > { %v731_v18 = vadd.f32 %v2563_v14, %v730_v8  ;;  %v1568_v22 = vmax.f32 %v1421_v13, 0.0 }
 0x1f8   : > { %v824_v26 = vmax.f32 %v731_v18, 0.0  ;;  %v746_v18 = vadd.f32 %v2563_v14, %v745_v34 }
 0x1f9   : > { %v1069_v12 = vpop.f32.mrf.mxu1 }
 0x1fa   : > { %v1070_v15 = vadd.f32 %v2635_v27, %v1069_v12 }
 0x1fb   : > { %v1422_v16 = vpop.f32.mrf.mxu2 }
 0x1fc   : > { %v1189_v19 = vmax.f32 %v1070_v15, 0.0  ;;  %v1423_v20 = vadd.f32 %v2723_v48, %v1422_v16  ;;  %v752_v16 = vpop.f32.mrf.mxu3 }
 0x1fd   : > { %v732_v21 = vpop.f32.mrf.mxu0 }
 0x1fe   : > { %v1239_v23 = vpack.c.bf16 %v1189_v19, %v1188_v17  ;;  %v1569_v24 = vmax.f32 %v1423_v20, 0.0  ;;  %v733_v25 = vadd.f32 %v2563_v14, %v732_v21  ;;  %v748_v21 = vadd.f32 %v2563_v14, %v747_v50 }
 0x200   : > { %v2152_v28 = vpack.c.bf16 %v1569_v24, %v1568_v22  ;;  %v825_v29 = vmax.f32 %v733_v25, 0.0  ;;  %2066 = vmatmul.msk.bf16.gmra.mxu2 %vm1294_vm3, %v1239_v23 }
 0x201   : > { %v1072_v30 = vpop.f32.mrf.mxu1 }
 0x202   : > { %2292 = vst [vmem:[%s2737_s13 + $0x20] sm:$0xff] %v2152_v28   ;;  %v866_v31 = vpack.c.bf16 %v825_v29, %v824_v26  ;;  %v1073_v35 = vadd.f32 %v2635_v27, %v1072_v30  ;;  %v830_v28 = vmax.f32 %v746_v18, 0.0  ;;  %v2830_v18 = vld [vmem:[%s2980_s2] ss:$0 sm:$0xff] }
 0x203   : > { %v1425_v32 = vpop.f32.mrf.mxu2 }
 0x204   : > { %2027 = vmatmul.msk.bf16.gmra.mxu1 %vm896_vm2, %v866_v31  ;;  %v1426_v37 = vadd.f32 %v2723_v48, %v1425_v32  ;;  %v1190_v40 = vmax.f32 %v1073_v35, 0.0  ;;  %v755_v29 = vpop.f32.mrf.mxu3  ;;  %v831_v31 = vmax.f32 %v748_v21, 0.0 }
 0x205   : > { %v735_v33 = vpop.f32.mrf.mxu0 }
 0x206   : > { %v736_v41 = vadd.f32 %v2563_v14, %v735_v33  ;;  %v1570_v45 = vmax.f32 %v1426_v37, 0.0 }
 0x208   : > { %v826_v51 = vmax.f32 %v736_v41, 0.0 }
 0x209   : > { %v1074_v36 = vpop.f32.mrf.mxu1 }
 0x20a   : > { %v1075_v38 = vadd.f32 %v2635_v27, %v1074_v36  ;;  %v869_v36 = vpack.c.bf16 %v831_v31, %v830_v28 }
 0x20b   : > { %v1427_v39 = vpop.f32.mrf.mxu2 }
 0x20c   : > { %v1191_v42 = vmax.f32 %v1075_v38, 0.0  ;;  %v1428_v43 = vadd.f32 %v2723_v48, %v1427_v39  ;;  %v757_v38 = vpop.f32.mrf.mxu3 }
 0x20d   : > { %v737_v44 = vpop.f32.mrf.mxu0 }
 0x20e   : > { %v1240_v46 = vpack.c.bf16 %v1191_v42, %v1190_v40  ;;  %v1571_v47 = vmax.f32 %v1428_v43, 0.0  ;;  %v738_v49 = vadd.f32 %v2563_v14, %v737_v44  ;;  %v751_v40 = vadd.f32 %v2563_v14, %v750_v60 }
 0x20f   : > { %v753_v43 = vadd.f32 %v2563_v14, %v752_v16 }
 0x210   : > { %v2157_v52 = vpack.c.bf16 %v1571_v47, %v1570_v45  ;;  %v827_v53 = vmax.f32 %v738_v49, 0.0  ;;  %2067 = vmatmul.msk.bf16.gmra.mxu2 %vm1294_vm3, %v1240_v46  ;;  %v832_v50 = vmax.f32 %v751_v40, 0.0 }
 0x211   : > { %v1077_v54 = vpop.f32.mrf.mxu1 }
 0x212   : > { %2293 = vst [vmem:[%s2737_s13 + $0x28] sm:$0xff] %v2157_v52   ;;  %v867_v55 = vpack.c.bf16 %v827_v53, %v826_v51  ;;  %v1078_v58 = vadd.f32 %v2635_v27, %v1077_v54  ;;  %v833_v52 = vmax.f32 %v753_v43, 0.0 }
 0x213   : > { %v1430_v56 = vpop.f32.mrf.mxu2 }
 0x214   : > { %2028 = vmatmul.msk.bf16.gmra.mxu1 %vm896_vm2, %v867_v55  ;;  %v1431_v2 = vadd.f32 %v2723_v48, %v1430_v56  ;;  %v1192_v63 = vmax.f32 %v1078_v58, 0.0  ;;  %v870_v58 = vpack.c.bf16 %v833_v52, %v832_v50 }
 0x215   : > { %v740_v57 = vpop.f32.mrf.mxu0 }
 0x216   : > { %v741_v6 = vadd.f32 %v2563_v14, %v740_v57  ;;  %v1572_v3 = vmax.f32 %v1431_v2, 0.0  ;;  %v760_v57 = vpop.f32.mrf.mxu3  ;;  %v756_v2 = vadd.f32 %v2563_v14, %v755_v29 }
 0x218   : > { %v828_v7 = vmax.f32 %v741_v6, 0.0 }
 0x219   : > { %v1079_v59 = vpop.f32.mrf.mxu1 }
 0x21a   : > { %v1080_v61 = vadd.f32 %v2635_v27, %v1079_v59 }
 0x21b   : > { %v1432_v62 = vpop.f32.mrf.mxu2 }
 0x21c   : > { %v1193_v0 = vmax.f32 %v1080_v61, 0.0  ;;  %v1433_v1 = vadd.f32 %v2723_v48, %v1432_v62 }
 0x21d   : > { %v742_v9 = vpop.f32.mrf.mxu0 }
 0x21e   : > { %v1241_v4 = vpack.c.bf16 %v1193_v0, %v1192_v63  ;;  %v1573_v5 = vmax.f32 %v1433_v1, 0.0  ;;  %v743_v10 = vadd.f32 %v2563_v14, %v742_v9  ;;  %v758_v63 = vadd.f32 %v2563_v14, %v757_v38  ;;  %v762_v1 = vpop.f32.mrf.mxu3 }
 0x220   : > { %v2162_v8 = vpack.c.bf16 %v1573_v5, %v1572_v3  ;;  %v829_v11 = vmax.f32 %v743_v10, 0.0  ;;  %2068 = vmatmul.msk.bf16.gmra.mxu2 %vm1294_vm3, %v1241_v4  ;;  %v834_v5 = vmax.f32 %v756_v2, 0.0 }
 0x221   : > { %v1082_v12 = vpop.f32.mrf.mxu1 }
 0x222   : > { %2294 = vst [vmem:[%s2737_s13 + $0x30] sm:$0xff] %v2162_v8   ;;  %v868_v13 = vpack.c.bf16 %v829_v11, %v828_v7  ;;  %v1083_v17 = vadd.f32 %v2635_v27, %v1082_v12  ;;  %v835_v7 = vmax.f32 %v758_v63, 0.0 }
 0x223   : > { %v1435_v15 = vpop.f32.mrf.mxu2 }
 0x224   : > { %2029 = vmatmul.msk.bf16.vlgmr.msrb.gmra.mxu3 %vm896_vm2, %v868_v13  ;;  %v1436_v20 = vadd.f32 %v2723_v48, %v1435_v15  ;;  %v1194_v24 = vmax.f32 %v1083_v17, 0.0  ;;  %v871_v15 = vpack.c.bf16 %v835_v7, %v834_v5 }
 0x226   : > { %v1574_v30 = vmax.f32 %v1436_v20, 0.0  ;;  %v765_v16 = vpop.f32.mrf.mxu3 }
 0x227   : > { %v766_v40 = vadd.f32 %v2830_v18, %v765_v16 }
 0x229   : > { %v1084_v19 = vpop.f32.mrf.mxu1 }
 0x22a   : > { %v1085_v22 = vadd.f32 %v2635_v27, %v1084_v19  ;;  %v761_v19 = vadd.f32 %v2830_v18, %v760_v57 }
 0x22b   : > { %v1437_v23 = vpop.f32.mrf.mxu2 }
 0x22c   : > { %v1195_v25 = vmax.f32 %v1085_v22, 0.0  ;;  %v1438_v26 = vadd.f32 %v2723_v48, %v1437_v23  ;;  %v763_v22 = vadd.f32 %v2830_v18, %v762_v1  ;;  %v836_v29 = vmax.f32 %v761_v19, 0.0 }
 0x22e   : > { %v1242_v32 = vpack.c.bf16 %v1195_v25, %v1194_v24  ;;  %v1575_v33 = vmax.f32 %v1438_v26, 0.0  ;;  %v837_v31 = vmax.f32 %v763_v22, 0.0 }
 0x230   : > { %v2167_v34 = vpack.c.bf16 %v1575_v33, %v1574_v30  ;;  %2069 = vmatmul.msk.bf16.gmra.mxu2 %vm1294_vm3, %v1242_v32 }
 0x231   : > { %v1087_v35 = vpop.f32.mrf.mxu1 }
 0x232   : > { %2295 = vst [vmem:[%s2737_s13 + $0x38] sm:$0xff] %v2167_v34   ;;  %v1088_v39 = vadd.f32 %v2635_v27, %v1087_v35  ;;  %v767_v34 = vpop.f32.mrf.mxu3 }
 0x233   : > { %v1440_v37 = vpop.f32.mrf.mxu2 }
 0x234   : > { %2030 = vmatmul.msk.bf16.gmra.mxu3 %vm896_vm2, %v869_v36  ;;  %v1441_v42 = vadd.f32 %v2723_v48, %v1440_v37  ;;  %v1196_v46 = vmax.f32 %v1088_v39, 0.0  ;;  %v872_v37 = vpack.c.bf16 %v837_v31, %v836_v29 }
 0x236   : > { %v1576_v51 = vmax.f32 %v1441_v42, 0.0 }
 0x239   : > { %v1089_v41 = vpop.f32.mrf.mxu1 }
 0x23a   : > { %v1090_v44 = vadd.f32 %v2635_v27, %v1089_v41  ;;  %v770_v42 = vpop.f32.mrf.mxu3 }
 0x23b   : > { %v1442_v45 = vpop.f32.mrf.mxu2 }
 0x23c   : > { %v1197_v47 = vmax.f32 %v1090_v44, 0.0  ;;  %v1443_v49 = vadd.f32 %v2723_v48, %v1442_v45  ;;  %v768_v44 = vadd.f32 %v2830_v18, %v767_v34 }
 0x23e   : > { %v1243_v53 = vpack.c.bf16 %v1197_v47, %v1196_v46  ;;  %v1577_v54 = vmax.f32 %v1443_v49, 0.0 }
 0x240   : > { %v2172_v55 = vpack.c.bf16 %v1577_v54, %v1576_v51  ;;  %2070 = vmatmul.msk.bf16.gmra.mxu2 %vm1294_vm3, %v1243_v53  ;;  %v838_v51 = vmax.f32 %v766_v40, 0.0  ;;  %v839_v53 = vmax.f32 %v768_v44, 0.0 }
 0x241   : > { %v1092_v56 = vpop.f32.mrf.mxu1 }
 0x242   : > { %2296 = vst [vmem:[%s2737_s13 + $0x40] sm:$0xff] %v2172_v55   ;;  %v1093_v60 = vadd.f32 %v2635_v27, %v1092_v56 }
 0x243   : > { %v1445_v59 = vpop.f32.mrf.mxu2 }
 0x244   : > { %2031 = vmatmul.msk.bf16.gmra.mxu3 %vm896_vm2, %v870_v58  ;;  %v1446_v62 = vadd.f32 %v2723_v48, %v1445_v59  ;;  %v1198_v9 = vmax.f32 %v1093_v60, 0.0  ;;  %v873_v58 = vpack.c.bf16 %v839_v53, %v838_v51  ;;  %v772_v60 = vpop.f32.mrf.mxu3 }
 0x246   : > { %v1578_v10 = vmax.f32 %v1446_v62, 0.0 }
 0x249   : > { %v1094_v61 = vpop.f32.mrf.mxu1 }
 0x24a   : > { %v1095_v6 = vadd.f32 %v2635_v27, %v1094_v61  ;;  %v771_v61 = vadd.f32 %v2830_v18, %v770_v42 }
 0x24b   : > { %v1447_v0 = vpop.f32.mrf.mxu2 }
 0x24c   : > { %v1199_v3 = vmax.f32 %v1095_v6, 0.0  ;;  %v1448_v4 = vadd.f32 %v2723_v48, %v1447_v0  ;;  %v773_v6 = vadd.f32 %v2830_v18, %v772_v60  ;;  %v840_v5 = vmax.f32 %v771_v61, 0.0 }
 0x24e   : > { %v1244_v8 = vpack.c.bf16 %v1199_v3, %v1198_v9  ;;  %v1579_v11 = vmax.f32 %v1448_v4, 0.0 }
 0x250   : > { %v2177_v12 = vpack.c.bf16 %v1579_v11, %v1578_v10  ;;  %2071 = vmatmul.msk.bf16.gmra.mxu2 %vm1294_vm3, %v1244_v8  ;;  %v775_v10 = vpop.f32.mrf.mxu3  ;;  %v841_v8 = vmax.f32 %v773_v6, 0.0 }
 0x251   : > { %v1097_v13 = vpop.f32.mrf.mxu1 }
 0x252   : > { %2297 = vst [vmem:[%s2737_s13 + $0x48] sm:$0xff] %v2177_v12   ;;  %v1098_v17 = vadd.f32 %v2635_v27, %v1097_v13 }
 0x253   : > { %v1450_v14 = vpop.f32.mrf.mxu2 }
 0x254   : > { %2032 = vmatmul.msk.bf16.gmra.mxu3 %vm896_vm2, %v871_v15  ;;  %v1451_v21 = vadd.f32 %v2723_v48, %v1450_v14  ;;  %v1200_v25 = vmax.f32 %v1098_v17, 0.0  ;;  %v874_v14 = vpack.c.bf16 %v841_v8, %v840_v5 }
 0x256   : > { %v1580_v30 = vmax.f32 %v1451_v21, 0.0 }
 0x258   : > { %v777_v17 = vpop.f32.mrf.mxu3 }
 0x259   : > { %v1099_v20 = vpop.f32.mrf.mxu1 }
 0x25a   : > { %v1100_v23 = vadd.f32 %v2635_v27, %v1099_v20  ;;  %v776_v20 = vadd.f32 %v2830_v18, %v775_v10 }
 0x25b   : > { %v1452_v24 = vpop.f32.mrf.mxu2 }
 0x25c   : > { %v1201_v26 = vmax.f32 %v1100_v23, 0.0  ;;  %v1453_v28 = vadd.f32 %v2723_v48, %v1452_v24  ;;  %v778_v23 = vadd.f32 %v2830_v18, %v777_v17 }
 0x25e   : > { %v1245_v32 = vpack.c.bf16 %v1201_v26, %v1200_v25  ;;  %v1581_v33 = vmax.f32 %v1453_v28, 0.0 }
 0x260   : > { %v2182_v35 = vpack.c.bf16 %v1581_v33, %v1580_v30  ;;  %2072 = vmatmul.msk.bf16.gmra.mxu2 %vm1294_vm3, %v1245_v32  ;;  %v842_v30 = vmax.f32 %v776_v20, 0.0  ;;  %v843_v32 = vmax.f32 %v778_v23, 0.0 }
 0x261   : > { %v1102_v36 = vpop.f32.mrf.mxu1 }
 0x262   : > { %2298 = vst [vmem:[%s2737_s13 + $0x50] sm:$0xff] %v2182_v35   ;;  %v1103_v39 = vadd.f32 %v2635_v27, %v1102_v36 }
 0x263   : > { %v1455_v38 = vpop.f32.mrf.mxu2 }
 0x264   : > { %2033 = vmatmul.msk.bf16.gmra.mxu3 %vm896_vm2, %v872_v37  ;;  %v1456_v43 = vadd.f32 %v2723_v48, %v1455_v38  ;;  %v1202_v47 = vmax.f32 %v1103_v39, 0.0  ;;  %v875_v37 = vpack.c.bf16 %v843_v32, %v842_v30 }
 0x266   : > { %v1582_v52 = vmax.f32 %v1456_v43, 0.0 }
 0x269   : > { %v1104_v41 = vpop.f32.mrf.mxu1 }
 0x26a   : > { %v1105_v45 = vadd.f32 %v2635_v27, %v1104_v41 }
 0x26b   : > { %v1457_v46 = vpop.f32.mrf.mxu2 }
 0x26c   : > { %v1203_v49 = vmax.f32 %v1105_v45, 0.0  ;;  %v1458_v50 = vadd.f32 %v2723_v48, %v1457_v46 }
 0x26e   : > { %v1246_v54 = vpack.c.bf16 %v1203_v49, %v1202_v47  ;;  %v1583_v55 = vmax.f32 %v1458_v50, 0.0 }
 0x270   : > { %v2187_v56 = vpack.c.bf16 %v1583_v55, %v1582_v52  ;;  %2073 = vmatmul.msk.bf16.gmra.mxu2 %vm1294_vm3, %v1246_v54 }
 0x271   : > { %v1107_v57 = vpop.f32.mrf.mxu1 }
 0x272   : > { %2299 = vst [vmem:[%s2737_s13 + $0x58] sm:$0xff] %v2187_v56   ;;  %v1108_v2 = vadd.f32 %v2635_v27, %v1107_v57 }
 0x273   : > { %v1460_v59 = vpop.f32.mrf.mxu2 }
 0x274   : > { %2034 = vmatmul.msk.bf16.gmra.mxu3 %vm896_vm2, %v873_v58  ;;  %v1461_v63 = vadd.f32 %v2723_v48, %v1460_v59  ;;  %v1204_v9 = vmax.f32 %v1108_v2, 0.0 }
 0x276   : > { %v1584_v7 = vmax.f32 %v1461_v63, 0.0 }
 0x279   : > { %v1109_v62 = vpop.f32.mrf.mxu1 }
 0x27a   : > { %v1110_v0 = vadd.f32 %v2635_v27, %v1109_v62 }
 0x27b   : > { %v1462_v1 = vpop.f32.mrf.mxu2 }
 0x27c   : > { %v1205_v3 = vmax.f32 %v1110_v0, 0.0  ;;  %v1463_v4 = vadd.f32 %v2723_v48, %v1462_v1 }
 0x27e   : > { %v1247_v11 = vpack.c.bf16 %v1205_v3, %v1204_v9  ;;  %v1585_v12 = vmax.f32 %v1463_v4, 0.0 }
 0x280   : > { %v2192_v13 = vpack.c.bf16 %v1585_v12, %v1584_v7  ;;  %2074 = vmatmul.msk.bf16.gmra.mxu2 %vm1294_vm3, %v1247_v11 }
 0x281   : > { %v1112_v15 = vpop.f32.mrf.mxu1 }
 0x282   : > { %2300 = vst [vmem:[%s2737_s13 + $0x60] sm:$0xff] %v2192_v13   ;;  %v1113_v19 = vadd.f32 %v2635_v27, %v1112_v15 }
 0x283   : > { %v1465_v16 = vpop.f32.mrf.mxu2 }
 0x284   : > { %2035 = vmatmul.msk.bf16.gmra.mxu3 %vm896_vm2, %v874_v14  ;;  %v1466_v22 = vadd.f32 %v2723_v48, %v1465_v16  ;;  %v1206_v26 = vmax.f32 %v1113_v19, 0.0 }
 0x286   : > { %v1586_v31 = vmax.f32 %v1466_v22, 0.0 }
 0x289   : > { %v1114_v21 = vpop.f32.mrf.mxu1 }
 0x28a   : > { %v1115_v24 = vadd.f32 %v2635_v27, %v1114_v21  ;;  %v2870_v27 = vld [vmem:[%s2982_s4] ss:$0 sm:$0xff] }
 0x28b   : > { %v1467_v25 = vpop.f32.mrf.mxu2 }
 0x28c   : > { %v1207_v28 = vmax.f32 %v1115_v24, 0.0  ;;  %v1468_v29 = vadd.f32 %v2723_v48, %v1467_v25 }
 0x28e   : > { %v1248_v33 = vpack.c.bf16 %v1207_v28, %v1206_v26  ;;  %v1587_v34 = vmax.f32 %v1468_v29, 0.0 }
 0x290   : > { %v2197_v35 = vpack.c.bf16 %v1587_v34, %v1586_v31  ;;  %2075 = vmatmul.msk.bf16.gmra.mxu2 %vm1294_vm3, %v1248_v33 }
 0x291   : > { %v1117_v36 = vpop.f32.mrf.mxu1 }
 0x292   : > { %2301 = vst [vmem:[%s2737_s13 + $0x68] sm:$0xff] %v2197_v35   ;;  %v1118_v18 = vadd.f32 %v2870_v27, %v1117_v36 }
 0x293   : > { %v1470_v38 = vpop.f32.mrf.mxu2 }
 0x294   : > { %2036 = vmatmul.msk.bf16.gmra.mxu3 %vm896_vm2, %v875_v37  ;;  %v1471_v40 = vadd.f32 %v2723_v48, %v1470_v38  ;;  %v1208_v43 = vmax.f32 %v1118_v18, 0.0 }
 0x296   : > { %v1588_v46 = vmax.f32 %v1471_v40, 0.0 }
 0x299   : > { %v1119_v39 = vpop.f32.mrf.mxu1 }
 0x29a   : > { %v1120_v41 = vadd.f32 %v2870_v27, %v1119_v39 }
 0x29b   : > { %v1472_v42 = vpop.f32.mrf.mxu2 }
 0x29c   : > { %v1209_v44 = vmax.f32 %v1120_v41, 0.0  ;;  %v1473_v45 = vadd.f32 %v2723_v48, %v1472_v42 }
 0x29e   : > { %v1249_v47 = vpack.c.bf16 %v1209_v44, %v1208_v43  ;;  %v1589_v49 = vmax.f32 %v1473_v45, 0.0 }
 0x2a0   : > { %v2202_v50 = vpack.c.bf16 %v1589_v49, %v1588_v46  ;;  %2076 = vmatmul.msk.bf16.gmra.mxu2 %vm1294_vm3, %v1249_v47 }
 0x2a2   : > { %2302 = vst [vmem:[%s2737_s13 + $0x70] sm:$0xff] %v2202_v50  }
 0x2a3   : > { %v1475_v51 = vpop.f32.mrf.mxu2 }
 0x2a4   : > { %v1476_v53 = vadd.f32 %v2723_v48, %v1475_v51 }
 0x2a6   : > { %v1590_v56 = vmax.f32 %v1476_v53, 0.0 }
 0x2a7   : > { %v1122_v52 = vpop.f32.mrf.mxu3 }
 0x2a8   : > { %v1123_v57 = vadd.f32 %v2870_v27, %v1122_v52 }
 0x2aa   : > { %v1210_v61 = vmax.f32 %v1123_v57, 0.0 }
 0x2ab   : > { %v1477_v54 = vpop.f32.mrf.mxu2 }
 0x2ac   : > { %v1478_v55 = vadd.f32 %v2723_v48, %v1477_v54 }
 0x2ae   : > { %v1591_v58 = vmax.f32 %v1478_v55, 0.0 }
 0x2af   : > { %v1124_v59 = vpop.f32.mrf.mxu3 }
 0x2b0   : > { %v2207_v60 = vpack.c.bf16 %v1591_v58, %v1590_v56  ;;  %v1125_v2 = vadd.f32 %v2870_v27, %v1124_v59 }
 0x2b2   : > { %2303 = vst [vmem:[%s2737_s13 + $0x78] sm:$0xff] %v2207_v60   ;;  %v1211_v62 = vmax.f32 %v1125_v2, 0.0 }
 0x2b3   : > { %v1480_v63 = vpop.f32.mrf.mxu2 }
 0x2b4   : > { %v1250_v6 = vpack.c.bf16 %v1211_v62, %v1210_v61  ;;  %v1481_v1 = vadd.f32 %v2723_v48, %v1480_v63 }
 0x2b6   : > { %2077 = vmatmul.msk.bf16.vlgmr.msra.gmra.mxu3 %vm1294_vm3, %v1250_v6  ;;  %v1592_v4 = vmax.f32 %v1481_v1, 0.0 }
 0x2b7   : > { %v1127_v0 = vpop.f32.mrf.mxu3 }
 0x2b8   : > { %v1128_v5 = vadd.f32 %v2870_v27, %v1127_v0 }
 0x2ba   : > { %v1212_v12 = vmax.f32 %v1128_v5, 0.0 }
 0x2bb   : > { %v1482_v9 = vpop.f32.mrf.mxu2 }
 0x2bc   : > { %v1483_v3 = vadd.f32 %v2723_v48, %v1482_v9 }
 0x2be   : > { %v1593_v10 = vmax.f32 %v1483_v3, 0.0 }
 0x2bf   : > { %v1129_v7 = vpop.f32.mrf.mxu3 }
 0x2c0   : > { %v2212_v8 = vpack.c.bf16 %v1593_v10, %v1592_v4  ;;  %v1130_v11 = vadd.f32 %v2870_v27, %v1129_v7 }
 0x2c2   : > { %2304 = vst [vmem:[%s2737_s13 + $0x80] sm:$0xff] %v2212_v8   ;;  %v1213_v13 = vmax.f32 %v1130_v11, 0.0 }
 0x2c3   : > { %v1485_v15 = vpop.f32.mrf.mxu2 }
 0x2c4   : > { %v1251_v14 = vpack.c.bf16 %v1213_v13, %v1212_v12  ;;  %v1486_v17 = vadd.f32 %v2723_v48, %v1485_v15 }
 0x2c6   : > { %2078 = vmatmul.msk.bf16.gmra.mxu3 %vm1294_vm3, %v1251_v14  ;;  %v1594_v21 = vmax.f32 %v1486_v17, 0.0 }
 0x2c7   : > { %v1132_v16 = vpop.f32.mrf.mxu3 }
 0x2c8   : > { %v1133_v22 = vadd.f32 %v2870_v27, %v1132_v16 }
 0x2ca   : > { %v1214_v28 = vmax.f32 %v1133_v22, 0.0 }
 0x2cb   : > { %v1487_v19 = vpop.f32.mrf.mxu2 }
 0x2cc   : > { %v1488_v20 = vadd.f32 %v2723_v48, %v1487_v19 }
 0x2ce   : > { %v1595_v23 = vmax.f32 %v1488_v20, 0.0 }
 0x2cf   : > { %v1134_v24 = vpop.f32.mrf.mxu3 }
 0x2d0   : > { %v2217_v25 = vpack.c.bf16 %v1595_v23, %v1594_v21  ;;  %v1135_v26 = vadd.f32 %v2870_v27, %v1134_v24 }
 0x2d2   : > { %2305 = vst [vmem:[%s2737_s13 + $0x88] sm:$0xff] %v2217_v25   ;;  %v1215_v29 = vmax.f32 %v1135_v26, 0.0 }
 0x2d3   : > { %v1490_v30 = vpop.f32.mrf.mxu2 }
 0x2d4   : > { %v1252_v31 = vpack.c.bf16 %v1215_v29, %v1214_v28  ;;  %v1491_v33 = vadd.f32 %v2723_v48, %v1490_v30 }
 0x2d6   : > { %2079 = vmatmul.msk.bf16.gmra.mxu3 %vm1294_vm3, %v1252_v31  ;;  %v1596_v36 = vmax.f32 %v1491_v33, 0.0 }
 0x2d7   : > { %v1137_v32 = vpop.f32.mrf.mxu3 }
 0x2d8   : > { %v1138_v37 = vadd.f32 %v2870_v27, %v1137_v32 }
 0x2da   : > { %v1216_v41 = vmax.f32 %v1138_v37, 0.0 }
 0x2db   : > { %v1492_v34 = vpop.f32.mrf.mxu2 }
 0x2dc   : > { %v1493_v35 = vadd.f32 %v2723_v48, %v1492_v34 }
 0x2de   : > { %v1597_v38 = vmax.f32 %v1493_v35, 0.0 }
 0x2df   : > { %v1139_v18 = vpop.f32.mrf.mxu3 }
 0x2e0   : > { %v2222_v39 = vpack.c.bf16 %v1597_v38, %v1596_v36  ;;  %v1140_v40 = vadd.f32 %v2870_v27, %v1139_v18 }
 0x2e2   : > { %2306 = vst [vmem:[%s2737_s13 + $0x90] sm:$0xff] %v2222_v39   ;;  %v1217_v42 = vmax.f32 %v1140_v40, 0.0 }
 0x2e3   : > { %v1495_v43 = vpop.f32.mrf.mxu2 }
 0x2e4   : > { %v1253_v44 = vpack.c.bf16 %v1217_v42, %v1216_v41  ;;  %v1496_v46 = vadd.f32 %v2723_v48, %v1495_v43 }
 0x2e6   : > { %2080 = vmatmul.msk.bf16.gmra.mxu3 %vm1294_vm3, %v1253_v44  ;;  %v1598_v50 = vmax.f32 %v1496_v46, 0.0 }
 0x2e7   : > { %v1142_v45 = vpop.f32.mrf.mxu3 }
 0x2e8   : > { %v1143_v51 = vadd.f32 %v2870_v27, %v1142_v45 }
 0x2ea   : > { %v1218_v56 = vmax.f32 %v1143_v51, 0.0 }
 0x2eb   : > { %v1497_v47 = vpop.f32.mrf.mxu2 }
 0x2ec   : > { %v1498_v49 = vadd.f32 %v2723_v48, %v1497_v47 }
 0x2ee   : > { %v1599_v52 = vmax.f32 %v1498_v49, 0.0 }
 0x2ef   : > { %v1144_v53 = vpop.f32.mrf.mxu3 }
 0x2f0   : > { %v2227_v54 = vpack.c.bf16 %v1599_v52, %v1598_v50  ;;  %v1145_v55 = vadd.f32 %v2870_v27, %v1144_v53 }
 0x2f2   : > { %2307 = vst [vmem:[%s2737_s13 + $0x98] sm:$0xff] %v2227_v54   ;;  %v1219_v57 = vmax.f32 %v1145_v55, 0.0 }
 0x2f3   : > { %v1500_v58 = vpop.f32.mrf.mxu2 }
 0x2f4   : > { %v1254_v59 = vpack.c.bf16 %v1219_v57, %v1218_v56  ;;  %v1501_v2 = vadd.f32 %v2723_v48, %v1500_v58 }
 0x2f6   : > { %2081 = vmatmul.msk.bf16.gmra.mxu3 %vm1294_vm3, %v1254_v59  ;;  %v1600_v63 = vmax.f32 %v1501_v2, 0.0 }
 0x2f7   : > { %v1147_v60 = vpop.f32.mrf.mxu3 }
 0x2f8   : > { %v1148_v6 = vadd.f32 %v2870_v27, %v1147_v60  ;;  %v2373_v60 = vld [vmem:[%s2984_s6] ss:$0 sm:$0xff] }
 0x2fa   : > { %v1220_v4 = vmax.f32 %v1148_v6, 0.0 }
 0x2fb   : > { %v1502_v61 = vpop.f32.mrf.mxu2 }
 0x2fc   : > { %v1503_v62 = vadd.f32 %v2723_v48, %v1502_v61 }
 0x2fe   : > { %v1601_v0 = vmax.f32 %v1503_v62, 0.0 }
 0x2ff   : > { %v1149_v1 = vpop.f32.mrf.mxu3 }
 0x300   : > { %v2232_v9 = vpack.c.bf16 %v1601_v0, %v1600_v63  ;;  %v1150_v3 = vadd.f32 %v2870_v27, %v1149_v1 }
 0x302   : > { %2308 = vst [vmem:[%s2737_s13 + $0xa0] sm:$0xff] %v2232_v9   ;;  %v1221_v5 = vmax.f32 %v1150_v3, 0.0 }
 0x303   : > { %v1505_v10 = vpop.f32.mrf.mxu2 }
 0x304   : > { %v1255_v7 = vpack.c.bf16 %v1221_v5, %v1220_v4  ;;  %v1506_v11 = vadd.f32 %v2723_v48, %v1505_v10 }
 0x306   : > { %2082 = vmatmul.msk.bf16.gmra.mxu3 %vm1294_vm3, %v1255_v7  ;;  %v1602_v15 = vmax.f32 %v1506_v11, 0.0 }
 0x307   : > { %v1152_v8 = vpop.f32.mrf.mxu3 }
 0x308   : > { %v1153_v14 = vadd.f32 %v2870_v27, %v1152_v8 }
 0x30a   : > { %v1222_v21 = vmax.f32 %v1153_v14, 0.0 }
 0x30b   : > { %v1507_v12 = vpop.f32.mrf.mxu2 }
 0x30c   : > { %v1508_v13 = vadd.f32 %v2723_v48, %v1507_v12 }
 0x30e   : > { %v1603_v16 = vmax.f32 %v1508_v13, 0.0 }
 0x30f   : > { %v1154_v17 = vpop.f32.mrf.mxu3 }
 0x310   : > { %v2237_v19 = vpack.c.bf16 %v1603_v16, %v1602_v15  ;;  %v1155_v20 = vadd.f32 %v2870_v27, %v1154_v17 }
 0x312   : > { %2309 = vst [vmem:[%s2737_s13 + $0xa8] sm:$0xff] %v2237_v19   ;;  %v1223_v22 = vmax.f32 %v1155_v20, 0.0 }
 0x313   : > { %v1510_v23 = vpop.f32.mrf.mxu2 }
 0x314   : > { %v1256_v24 = vpack.c.bf16 %v1223_v22, %v1222_v21  ;;  %v1511_v26 = vadd.f32 %v2723_v48, %v1510_v23 }
 0x316   : > { %2083 = vmatmul.msk.bf16.gmra.mxu3 %vm1294_vm3, %v1256_v24  ;;  %v1604_v30 = vmax.f32 %v1511_v26, 0.0 }
 0x317   : > { %v1157_v25 = vpop.f32.mrf.mxu3 }
 0x318   : > { %v1158_v31 = vadd.f32 %v2870_v27, %v1157_v25 }
 0x31a   : > { %v1224_v36 = vmax.f32 %v1158_v31, 0.0 }
 0x31b   : > { %v1512_v28 = vpop.f32.mrf.mxu2 }
 0x31c   : > { %v1513_v29 = vadd.f32 %v2723_v48, %v1512_v28 }
 0x31e   : > { %v1605_v32 = vmax.f32 %v1513_v29, 0.0 }
 0x31f   : > { %v1159_v33 = vpop.f32.mrf.mxu3 }
 0x320   : > { %v2242_v34 = vpack.c.bf16 %v1605_v32, %v1604_v30  ;;  %v1160_v35 = vadd.f32 %v2870_v27, %v1159_v33 }
 0x322   : > { %2310 = vst [vmem:[%s2737_s13 + $0xb0] sm:$0xff] %v2242_v34   ;;  %v1225_v37 = vmax.f32 %v1160_v35, 0.0 }
 0x323   : > { %v1515_v38 = vpop.f32.mrf.mxu2 }
 0x324   : > { %v1257_v18 = vpack.c.bf16 %v1225_v37, %v1224_v36  ;;  %v1516_v39 = vadd.f32 %v2723_v48, %v1515_v38 }
 0x326   : > { %2084 = vmatmul.msk.bf16.gmra.mxu3 %vm1294_vm3, %v1257_v18  ;;  %v1606_v42 = vmax.f32 %v1516_v39, 0.0 }
 0x32b   : > { %v1517_v40 = vpop.f32.mrf.mxu2 }
 0x32c   : > { %v1518_v41 = vadd.f32 %v2723_v48, %v1517_v40 }
 0x32e   : > { %v1607_v43 = vmax.f32 %v1518_v41, 0.0 }
 0x330   : > { %v2247_v44 = vpack.c.bf16 %v1607_v43, %v1606_v42 }
 0x332   : > { %2311 = vst [vmem:[%s2737_s13 + $0xb8] sm:$0xff] %v2247_v44  }
 0x339   : > { %v1520_v45 = vpop.f32.mrf.mxu3 }
 0x33a   : > { %v1521_v27 = vadd.f32 %v2723_v48, %v1520_v45 }
 0x33c   : > { %v1608_v49 = vmax.f32 %v1521_v27, 0.0 }
 0x341   : > { %v1522_v46 = vpop.f32.mrf.mxu3 }
 0x342   : > { %v1523_v47 = vadd.f32 %v2723_v48, %v1522_v46 }
 0x344   : > { %v1609_v50 = vmax.f32 %v1523_v47, 0.0 }
 0x346   : > { %v2252_v51 = vpack.c.bf16 %v1609_v50, %v1608_v49 }
 0x348   : > { %2312 = vst [vmem:[%s2737_s13 + $0xc0] sm:$0xff] %v2252_v51  }
 0x349   : > { %v1525_v52 = vpop.f32.mrf.mxu3 }
 0x34a   : > { %v1526_v53 = vadd.f32 %v2723_v48, %v1525_v52 }
 0x34c   : > { %v1610_v56 = vmax.f32 %v1526_v53, 0.0 }
 0x351   : > { %v1527_v54 = vpop.f32.mrf.mxu3 }
 0x352   : > { %v1528_v55 = vadd.f32 %v2723_v48, %v1527_v54 }
 0x354   : > { %v1611_v57 = vmax.f32 %v1528_v55, 0.0 }
 0x356   : > { %v2257_v58 = vpack.c.bf16 %v1611_v57, %v1610_v56 }
 0x358   : > { %2313 = vst [vmem:[%s2737_s13 + $0xc8] sm:$0xff] %v2257_v58  }
 0x359   : > { %v1530_v59 = vpop.f32.mrf.mxu3 }
 0x35a   : > { %v1531_v2 = vadd.f32 %v2373_v60, %v1530_v59 }
 0x35c   : > { %v1612_v63 = vmax.f32 %v1531_v2, 0.0 }
 0x361   : > { %v1532_v61 = vpop.f32.mrf.mxu3 }
 0x362   : > { %v1533_v62 = vadd.f32 %v2373_v60, %v1532_v61 }
 0x364   : > { %v1613_v6 = vmax.f32 %v1533_v62, 0.0 }
 0x366   : > { %v2262_v0 = vpack.c.bf16 %v1613_v6, %v1612_v63 }
 0x368   : > { %2314 = vst [vmem:[%s2737_s13 + $0xd0] sm:$0xff] %v2262_v0  }
 0x369   : > { %v1535_v1 = vpop.f32.mrf.mxu3 }
 0x36a   : > { %v1536_v48 = vadd.f32 %v2373_v60, %v1535_v1 }
 0x36c   : > { %v1614_v4 = vmax.f32 %v1536_v48, 0.0 }
 0x371   : > { %v1537_v9 = vpop.f32.mrf.mxu3 }
 0x372   : > { %v1538_v3 = vadd.f32 %v2373_v60, %v1537_v9 }
 0x374   : > { %v1615_v5 = vmax.f32 %v1538_v3, 0.0 }
 0x376   : > { %v2267_v10 = vpack.c.bf16 %v1615_v5, %v1614_v4 }
 0x378   : > { %2315 = vst [vmem:[%s2737_s13 + $0xd8] sm:$0xff] %v2267_v10  }
 0x379   : > { %v1540_v7 = vpop.f32.mrf.mxu3 }
 0x37a   : > { %v1541_v8 = vadd.f32 %v2373_v60, %v1540_v7 }
 0x37c   : > { %v1616_v13 = vmax.f32 %v1541_v8, 0.0 }
 0x381   : > { %v1542_v11 = vpop.f32.mrf.mxu3 }
 0x382   : > { %v1543_v12 = vadd.f32 %v2373_v60, %v1542_v11 }
 0x384   : > { %v1617_v15 = vmax.f32 %v1543_v12, 0.0 }
 0x386   : > { %v2272_v14 = vpack.c.bf16 %v1617_v15, %v1616_v13 }
 0x388   : > { %2316 = vst [vmem:[%s2737_s13 + $0xe0] sm:$0xff] %v2272_v14  }
 0x389   : > { %v1545_v16 = vpop.f32.mrf.mxu3 }
 0x38a   : > { %v1546_v17 = vadd.f32 %v2373_v60, %v1545_v16 }
 0x38c   : > { %v1618_v21 = vmax.f32 %v1546_v17, 0.0 }
 0x391   : > { %v1547_v19 = vpop.f32.mrf.mxu3 }
 0x392   : > { %v1548_v20 = vadd.f32 %v2373_v60, %v1547_v19 }
 0x394   : > { %v1619_v22 = vmax.f32 %v1548_v20, 0.0 }
 0x396   : > { %v2277_v23 = vpack.c.bf16 %v1619_v22, %v1618_v21 }
 0x398   : > { %2317 = vst [vmem:[%s2737_s13 + $0xe8] sm:$0xff] %v2277_v23  }
 0x399   : > { %v1550_v24 = vpop.f32.mrf.mxu3 }
 0x39a   : > { %v1551_v25 = vadd.f32 %v2373_v60, %v1550_v24 }
 0x39c   : > { %v1620_v29 = vmax.f32 %v1551_v25, 0.0 }
 0x3a1   : > { %v1552_v26 = vpop.f32.mrf.mxu3 }
 0x3a2   : > { %v1553_v28 = vadd.f32 %v2373_v60, %v1552_v26 }
 0x3a4   : > { %v1621_v30 = vmax.f32 %v1553_v28, 0.0 }
 0x3a6   : > { %v2282_v31 = vpack.c.bf16 %v1621_v30, %v1620_v29 }
 0x3a8   : > { %2318 = vst [vmem:[%s2737_s13 + $0xf0] sm:$0xff] %v2282_v31  }
 0x3a9   : > { %v1555_v32 = vpop.f32.mrf.mxu3 }
 0x3aa   : > { %v1556_v33 = vadd.f32 %v2373_v60, %v1555_v32 }
 0x3ac   : > { %v1622_v36 = vmax.f32 %v1556_v33, 0.0 }
 0x3b1   : > { %v1557_v34 = vpop.f32.mrf.mxu3 }
 0x3b2   : > { %v1558_v35 = vadd.f32 %v2373_v60, %v1557_v34 }
 0x3b4   : > { %v1623_v37 = vmax.f32 %v1558_v35, 0.0 }
 0x3b6   : > { %v2287_v38 = vpack.c.bf16 %v1623_v37, %v1622_v36 }
 0x3b8   : > { %2319 = vst [vmem:[%s2737_s13 + $0xf8] sm:$0xff] %v2287_v38  }
 0x3b9   : > { %2401 = shalt.err (!%p2398_p3)
}
 0x3ba   : > { %s2438_s8 = smov 64   ;;  %s2439_s13 = smov 4  }
 0x3bb   : > { %2327 = dma.vmem_to_hbm [thread:$0]  (%p2518_p5), %s1766_s29, 4096, %s1768_s9, %s1753_s19, %s2438_s8, %s2438_s8, %s2439_s13  }
 0x3bc PF: > { %p2333_p4 = scmp.ge.s32.totalorder %s2436_s27, 2  ;;  %s1782_s21 = sand.u32 1, %s2424_s24  }
 0x3bd   : > { %s1783_s22 = scalar_lea.sflag [#allocation3], %s1782_s21 }
 0x3be   : > { %p2330_p7 = pnand %p2333_p4, %p2522_p6 }
 0x3c0   : > { %p2331_p8 = pneg %p2330_p7 }
 0x3c2   : > { %2419 = dma.done.wait (%p2331_p8), %s1783_s22, 4096  }
 0x3c3   : > { %2421 = vsyncadd (%p2331_p8), %s1783_s22, 4294963200  ;;  %p17_p9 = scmp.ge.s32.totalorder %s2505_s30, 4   ;;  %s2988_s24 = smov %s2428_s25 }
 0x3c4   : > { %s2989_s25 = smov %s2432_s26  ;;  %s2990_s26 = smov %s2516_s10 }
 0x3c5   : > { %s2991_s27 = smov %s2505_s30  ;;  %19 = sbr.rel (!%p17_p9) target bundleno = 3 (0x3), region = 83 }
 0x3ca   :  { %1789 = vsyncpa [#allocation3], 1 }
 0x3cb   :  { %1791 = vsyncpa [#allocation3 + $0x1], 1 }

</bundles_post_ra>
